<compile_context>
chip_gen: v7x
topology: tpu7x:2x2x1
jax: 0.10.0
libtpu: 0.0.40
codegen_flags: <defaults>
</compile_context>

<pallas_src>
import numpy as np
import jax
import jax.numpy as jnp
from jax import lax
from jax.experimental import pallas as pl
from jax.experimental.pallas import tpu as pltpu

LN_EPS = 1e-5      # torch.nn.LayerNorm default eps
ATTN_EPS = 1e-6    # epsilon used by SGFormerAttention


def _round_up(x, m):
    return ((x + m - 1) // m) * m


def make_sg_stack(B, Bt, N, F, D_pad, D_real, num_layers):
    """Fused SGModule forward on a dense (B, N, *) batch, Bt graphs per grid step."""
    assert B % Bt == 0, "B must be divisible by graphs-per-step Bt"
    inv_d = 1.0 / float(D_real)
    n_dense = float(N)           # torch uses the dense max-node count N in the attention
    L = num_layers
    D2 = 2 * D_pad

    def kernel(x_ref, m_ref, w0_ref, b0_ref, g0_ref, bt0_ref,
               wqkv_ref, gl_ref, btl_ref, o_ref):
        # channel-validity mask: 1.0 for the first D_real lanes, 0.0 for the padding
        cmask = (lax.broadcasted_iota(jnp.int32, (1, 1, D_pad), 2) < D_real
                 ).astype(jnp.float32)
        # all-ones column (lane 0 of the second 128-lane half of v_ext); hoisted so the
        # broadcast is emitted once, not once per layer
        ones_col = (lax.broadcasted_iota(jnp.int32, (1, 1, D_pad), 2) == 0
                    ).astype(jnp.float32)
        ones_half = jnp.broadcast_to(ones_col, (Bt, N, D_pad))

        def layernorm(h, gamma, beta):
            # LayerNorm over the D_real real channels; padded lanes of h are exactly 0
            # by construction, so no pre-mask of h is needed for the mean.
            mu = jnp.sum(h, axis=-1, keepdims=True) * inv_d
            d = (h - mu) * cmask
            var = jnp.sum(d * d, axis=-1, keepdims=True) * inv_d
            return d * lax.rsqrt(var + LN_EPS) * gamma + beta

        x = x_ref[...]                       # (Bt, N, F)   -- unpadded input channels
        m = m_ref[...]                       # (Bt, N, 1)   node-validity mask

        # fcs[0] -> bns[0] -> relu   (dropout is eval-mode identity)
        h = jnp.einsum("bnf,fd->bnd", x, w0_ref[...],
                       preferred_element_type=jnp.float32) + b0_ref[...]
        h = jnp.maximum(layernorm(h, g0_ref[...], bt0_ref[...]), 0.0)

        # TODO(synk): for num_layers > ~4, switch this static unroll to lax.fori_loop.
        for l in range(num_layers):
            # fused QKV projection: one lane-dense (N,128)@(128,384) MXU pass per graph
            qkv = jnp.einsum("bnd,de->bne", h, wqkv_ref[l],
                             preferred_element_type=jnp.float32)
            q = qkv[..., 0:D_pad]
            k = qkv[..., D_pad:2 * D_pad]
            v = qkv[..., 2 * D_pad:3 * D_pad] * m        # masked_fill(~mask, 0)

            # epsilon injection on real channels only; padded lanes forced back to 0
            q = jnp.where(q == 0.0, ATTN_EPS, q) * cmask
            k = jnp.where(k == 0.0, ATTN_EPS, k) * cmask
            # L2-normalize via EUP rsqrt (padded lanes contribute 0 to the norm)
            q = q * lax.rsqrt(jnp.sum(q * q, axis=-1, keepdims=True))
            k = k * lax.rsqrt(jnp.sum(k * k, axis=-1, keepdims=True))

            # ks_sum / normalizer fused into the MXU passes: v_ext's lane D_pad is an
            # ALL-ones column (matches torch's ones([B, N]) -- padded rows included),
            # so column D_pad of kv_ext is ks_sum and lane D_pad of q @ kv_ext is
            # q . ks_sum.
            v_ext = jnp.concatenate([v, ones_half], axis=-1)        # (Bt, N, 2*D_pad)
            kv_ext = jnp.einsum("bnm,bne->bme", k, v_ext,
                                preferred_element_type=jnp.float32)  # (Bt, D_pad, 2*D_pad)
            attn_part = jnp.einsum("bnm,bme->bne", q, kv_ext,
                                   preferred_element_type=jnp.float32)  # (Bt, N, 2*D_pad)
            attn_num = attn_part[..., 0:D_pad] + n_dense * v
            normalizer = attn_part[..., D_pad:D_pad + 1] + n_dense       # (Bt, N, 1)
            # approx=False keeps the 1e-4 f32 tolerance; approx=True is a candidate
            # micro-opt but must be re-validated against the reference first.
            attn_out = attn_num * pl.reciprocal(normalizer, approx=False)

            h = (attn_out + h) * 0.5                     # residual average with layer_[l]
            h = jnp.maximum(layernorm(h, gl_ref[l], btl_ref[l]), 0.0)

        # write back only the real channels: (Bt, N, 32) f32, 4x fewer bytes than a
        # 128-lane padded slab (masked vst accepted -- bytes win at scale).
        o_ref[...] = h[..., 0:D_real]
        # TODO(synk): for large N (v7x VMEM ceiling), tile the node dim: pass 1 accumulates
        # kv_ext in VMEM scratch over node tiles on an "arbitrary" axis, pass 2 applies it.

    flops = 2 * B * N * (F * D_pad + num_layers * 7 * D_pad * D_pad)
    transcendentals = B * N * (3 * num_layers + (num_layers + 1))
    bytes_accessed = 4 * (B * N * F + B * N + B * N * D_real
                          + F * D_pad + 4 * D_pad
                          + num_layers * (D_pad * 3 * D_pad + 2 * D_pad))

    return pl.pallas_call(
        kernel,
        out_shape=jax.ShapeDtypeStruct((B, N, D_real), jnp.float32),
        grid=(B // Bt,),
        in_specs=[
            pl.BlockSpec((Bt, N, F), lambda g: (g, 0, 0)),             # x, unpadded channels
            pl.BlockSpec((Bt, N, 1), lambda g: (g, 0, 0)),             # node mask
            pl.BlockSpec((F, D_pad), lambda g: (0, 0)),                # W0 (resident)
            pl.BlockSpec((1, D_pad), lambda g: (0, 0)),                # b0
            pl.BlockSpec((1, D_pad), lambda g: (0, 0)),                # gamma0
            pl.BlockSpec((1, D_pad), lambda g: (0, 0)),                # beta0
            pl.BlockSpec((L, D_pad, 3 * D_pad), lambda g: (0, 0, 0)),  # fused Wq|Wk|Wv / layer
            pl.BlockSpec((L, 1, D_pad), lambda g: (0, 0, 0)),          # per-layer gamma
            pl.BlockSpec((L, 1, D_pad), lambda g: (0, 0, 0)),          # per-layer beta
        ],
        out_specs=pl.BlockSpec((Bt, N, D_real), lambda g: (g, 0, 0)),
        compiler_params=pltpu.CompilerParams(
            dimension_semantics=("parallel",),
            vmem_limit_bytes=32 * 1024 * 1024,
        ),
        cost_estimate=pl.CostEstimate(
            flops=int(flops),
            transcendentals=int(transcendentals),
            bytes_accessed=int(bytes_accessed),
        ),
    )


if __name__ == "__main__":
    in_channels, hidden, num_layers = 8, 32, 2
    B = 4
    Bt = 2          # graphs per grid step -> grid length B//Bt = 2 (keeps both v7x TCs busy)

    # graph assignment per node (deliberately unsorted): counts 8 / 6 / 7 / 5 over 4 graphs
    counts_true = [8, 6, 7, 5]
    batch_sorted_init = np.concatenate(
        [np.full(c, g, dtype=np.int32) for g, c in enumerate(counts_true)])
    perm0 = np.random.RandomState(0).permutation(batch_sorted_init.shape[0])
    batch_np = batch_sorted_init[perm0].astype(np.int32)
    num_nodes = batch_np.shape[0]

    key = jax.random.PRNGKey(0)
    keys = jax.random.split(key, 12)
    x_nodes = jax.random.normal(keys[0], (num_nodes, in_channels), jnp.float32)

    # --- deterministic parameter init (shapes from SGModule.__init__) ---------
    def lin(k, fin, fout):
        return jax.random.normal(k, (fin, fout), jnp.float32) * (1.0 / np.sqrt(fin))

    W0 = lin(keys[1], in_channels, hidden)                 # fcs[0]
    b0 = jax.random.normal(keys[2], (hidden,), jnp.float32) * 0.1
    g0 = jnp.ones((hidden,), jnp.float32)                  # bns[0]
    bt0 = jnp.zeros((hidden,), jnp.float32)

    layer_params = []
    ki = 3
    for _ in range(num_layers):
        Wq = lin(keys[ki], hidden, hidden)                 # SGFormerAttention.q (no bias)
        Wk = lin(keys[ki + 1], hidden, hidden)             # .k
        Wv = lin(keys[ki + 2], hidden, hidden)             # .v
        g = jnp.ones((hidden,), jnp.float32)               # bns[i+1]
        bt = jnp.zeros((hidden,), jnp.float32)
        layer_params.append((Wq, Wk, Wv, g, bt))
        ki += 3

    # --- glue: stable sort by batch, to_dense_batch, reverse permutation -----
    # TODO(synk): data-dependent shapes (sort / scatter / masked gather) done in host numpy/JAX
    indices = np.argsort(batch_np, kind="stable")
    batch_sorted = batch_np[indices]
    rev_perm = np.empty_like(indices)
    rev_perm[indices] = np.arange(num_nodes)
    counts = np.bincount(batch_sorted, minlength=B)
    N = int(counts.max())
    offsets = np.concatenate([[0], np.cumsum(counts)[:-1]])
    pos = np.arange(num_nodes) - offsets[batch_sorted]

    bidx = jnp.asarray(batch_sorted)
    pidx = jnp.asarray(pos)
    x_sorted = x_nodes[jnp.asarray(indices)]

    # --- layouts for the kernel -----------------------------------------------
    # x keeps its real 8 channels in HBM (no 16x channel padding); only the hidden dim
    # inside the kernel is lane-padded to 128.
    D_pad = _round_up(hidden, 128)

    x_dense = (jnp.zeros((B, N, in_channels), jnp.float32)
               .at[bidx, pidx, :].set(x_sorted))
    mask = jnp.zeros((B, N), jnp.float32).at[bidx, pidx].set(1.0)
    mask_col = mask[:, :, None]                               # (B, N, 1)

    def pad2(w, r, c):
        return jnp.zeros((r, c), jnp.float32).at[:w.shape[0], :w.shape[1]].set(w)

    def pad_row(v, c):
        return jnp.zeros((1, c), jnp.float32).at[0, :v.shape[0]].set(v)

    W0_p = pad2(W0, in_channels, D_pad)                       # (8, 128): only output dim padded
    b0_p = pad_row(b0, D_pad)
    g0_p = pad_row(g0, D_pad)                                 # zero-padded gamma/beta keep
    bt0_p = pad_row(bt0, D_pad)                               # padded channels at exactly 0

    wqkv_all = jnp.stack([
        jnp.concatenate([pad2(Wq, D_pad, D_pad),
                         pad2(Wk, D_pad, D_pad),
                         pad2(Wv, D_pad, D_pad)], axis=1)
        for (Wq, Wk, Wv, _, _) in layer_params], axis=0)      # (L, D_pad, 3*D_pad)
    gl_all = jnp.stack([pad_row(g, D_pad) for (_, _, _, g, _) in layer_params], axis=0)
    btl_all = jnp.stack([pad_row(bt, D_pad) for (_, _, _, _, bt) in layer_params], axis=0)

    # --- single fused Pallas forward pass --------------------------------------
    sg_stack = make_sg_stack(B, Bt, N, in_channels, D_pad, hidden, num_layers)
    h = sg_stack(x_dense, mask_col, W0_p, b0_p, g0_p, bt0_p, wqkv_all, gl_all, btl_all)

    # x[mask][rev_perm]: valid nodes in sorted order, restore original node order
    out = h[bidx, pidx][jnp.asarray(rev_perm)]
    out = jax.block_until_ready(out)
    assert out.shape == (num_nodes, hidden)

    # --- pure-JAX reference check (unpadded f32) -------------------------------
    def ref_forward():
        def layernorm(hh, gamma, beta):
            mu = jnp.mean(hh, axis=-1, keepdims=True)
            var = jnp.mean((hh - mu) ** 2, axis=-1, keepdims=True)
            return (hh - mu) / jnp.sqrt(var + LN_EPS) * gamma + beta

        xd = jnp.zeros((B, N, in_channels), jnp.float32).at[bidx, pidx].set(x_sorted)
        hh = jnp.maximum(layernorm(xd @ W0 + b0, g0, bt0), 0.0)
        for (Wq, Wk, Wv, g, bt) in layer_params:
            q = hh @ Wq
            k = hh @ Wk
            v = (hh @ Wv) * mask[:, :, None]
            q = jnp.where(q == 0.0, ATTN_EPS, q)
            k = jnp.where(k == 0.0, ATTN_EPS, k)
            q = q / jnp.linalg.norm(q, axis=-1, keepdims=True)
            k = k / jnp.linalg.norm(k, axis=-1, keepdims=True)
            kv = jnp.einsum("blm,bld->bmd", k, v)
            num = jnp.einsum("bnm,bmd->bnd", q, kv) + N * v
            ks_sum = k.sum(axis=1)
            denom = jnp.einsum("bnm,bm->bn", q, ks_sum)[..., None] + N
            hh = jnp.maximum(layernorm((num / denom + hh) * 0.5, g, bt), 0.0)
        return hh[bidx, pidx][jnp.asarray(rev_perm)]

    ref = jax.block_until_ready(ref_forward())
    err = float(jnp.max(jnp.abs(out - ref)))
    assert jnp.allclose(out, ref, rtol=1e-4, atol=1e-4), err

    print("KERNEL_OK")
</pallas_src>

<mosaic_0001>
module attributes {stable_mosaic.version = 11 : i64} {
  func.func @kernel(%arg0: i32, %arg1: memref<2x8x8xf32, #tpu.memory_space<vmem>>, %arg2: memref<2x8x1xf32, #tpu.memory_space<vmem>>, %arg3: memref<8x128xf32, #tpu.memory_space<vmem>>, %arg4: memref<1x128xf32, #tpu.memory_space<vmem>>, %arg5: memref<1x128xf32, #tpu.memory_space<vmem>>, %arg6: memref<1x128xf32, #tpu.memory_space<vmem>>, %arg7: memref<2x128x384xf32, #tpu.memory_space<vmem>>, %arg8: memref<2x1x128xf32, #tpu.memory_space<vmem>>, %arg9: memref<2x1x128xf32, #tpu.memory_space<vmem>>, %arg10: memref<2x8x32xf32, #tpu.memory_space<vmem>>) attributes {dimension_semantics = [#tpu.dimension_semantics<parallel>], iteration_bounds = array<i64: 2>, scalar_prefetch = 0 : i64, scratch_operands = 0 : i64, tpu.core_type = #tpu.core_type<tc>, window_params = [{transform_indices = @transform_0, window_bounds = array<i64: 2, 8, 8>}, {transform_indices = @transform_1, window_bounds = array<i64: 2, 8, 1>}, {pipeline_mode = #tpu.pipeline_mode<synchronous>, transform_indices = @transform_2, window_bounds = array<i64: 8, 128>}, {pipeline_mode = #tpu.pipeline_mode<synchronous>, transform_indices = @transform_3, window_bounds = array<i64: 1, 128>}, {pipeline_mode = #tpu.pipeline_mode<synchronous>, transform_indices = @transform_4, window_bounds = array<i64: 1, 128>}, {pipeline_mode = #tpu.pipeline_mode<synchronous>, transform_indices = @transform_5, window_bounds = array<i64: 1, 128>}, {pipeline_mode = #tpu.pipeline_mode<synchronous>, transform_indices = @transform_6, window_bounds = array<i64: 2, 128, 384>}, {pipeline_mode = #tpu.pipeline_mode<synchronous>, transform_indices = @transform_7, window_bounds = array<i64: 2, 1, 128>}, {pipeline_mode = #tpu.pipeline_mode<synchronous>, transform_indices = @transform_8, window_bounds = array<i64: 2, 1, 128>}, {transform_indices = @transform_9, window_bounds = array<i64: 2, 8, 32>}]} {
    %0 = tpu.iota {dimensions = array<i32: 2>} : vector<1x1x128xi32>
    %c32_i32 = arith.constant 32 : i32
    %1 = vector.broadcast %c32_i32 : i32 to vector<1x1x128xi32>
    %2 = arith.cmpi slt, %0, %1 : vector<1x1x128xi32>
    %3 = arith.extui %2 : vector<1x1x128xi1> to vector<1x1x128xi32>
    %4 = arith.sitofp %3 : vector<1x1x128xi32> to vector<1x1x128xf32>
    %5 = tpu.iota {dimensions = array<i32: 2>} : vector<1x1x128xi32>
    %c0_i32 = arith.constant 0 : i32
    %6 = vector.broadcast %c0_i32 : i32 to vector<1x1x128xi32>
    %7 = arith.cmpi eq, %5, %6 : vector<1x1x128xi32>
    %8 = arith.extui %7 : vector<1x1x128xi1> to vector<1x1x128xi32>
    %9 = arith.sitofp %8 : vector<1x1x128xi32> to vector<1x1x128xf32>
    %10 = vector.shape_cast %9 : vector<1x1x128xf32> to vector<1x1x128xf32>
    %11 = vector.broadcast %10 : vector<1x1x128xf32> to vector<2x8x128xf32>
    %c0 = arith.constant 0 : index
    %c0_0 = arith.constant 0 : index
    %c0_1 = arith.constant 0 : index
    %12 = vector.load %arg1[%c0, %c0_0, %c0_1] : memref<2x8x8xf32, #tpu.memory_space<vmem>>, vector<2x8x8xf32>
    %c0_2 = arith.constant 0 : index
    %c0_3 = arith.constant 0 : index
    %c0_4 = arith.constant 0 : index
    %13 = vector.load %arg2[%c0_2, %c0_3, %c0_4] : memref<2x8x1xf32, #tpu.memory_space<vmem>>, vector<2x8x1xf32>
    %c0_5 = arith.constant 0 : index
    %c0_6 = arith.constant 0 : index
    %14 = vector.load %arg3[%c0_5, %c0_6] : memref<8x128xf32, #tpu.memory_space<vmem>>, vector<8x128xf32>
    "tpu.trace_start"() <{level = 10 : i32, message = "bnf,fd->bnd"}> : () -> ()
    %cst = arith.constant dense<0.000000e+00> : vector<2x8x128xf32>
    %15 = tpu.matmul %12, %14, %cst {dimension_numbers = #tpu.dot_dimension_numbers<[2], [0], [0, 1], [1], [0, 0, 0, 1, 1, 1], [], []>} : vector<2x8x8xf32>, vector<8x128xf32>, vector<2x8x128xf32> -> vector<2x8x128xf32>
    "tpu.trace_stop"() : () -> ()
    %c0_7 = arith.constant 0 : index
    %c0_8 = arith.constant 0 : index
    %16 = vector.load %arg4[%c0_7, %c0_8] : memref<1x128xf32, #tpu.memory_space<vmem>>, vector<1x128xf32>
    %17 = vector.shape_cast %16 : vector<1x128xf32> to vector<1x1x128xf32>
    %18 = vector.broadcast %17 : vector<1x1x128xf32> to vector<2x8x128xf32>
    %19 = arith.addf %15, %18 : vector<2x8x128xf32>
    %c0_9 = arith.constant 0 : index
    %c0_10 = arith.constant 0 : index
    %20 = vector.load %arg5[%c0_9, %c0_10] : memref<1x128xf32, #tpu.memory_space<vmem>>, vector<1x128xf32>
    %c0_11 = arith.constant 0 : index
    %c0_12 = arith.constant 0 : index
    %21 = vector.load %arg6[%c0_11, %c0_12] : memref<1x128xf32, #tpu.memory_space<vmem>>, vector<1x128xf32>
    %cst_13 = arith.constant dense<0.000000e+00> : vector<2x8xf32>
    %22 = vector.multi_reduction <add>, %19, %cst_13 [2] : vector<2x8x128xf32> to vector<2x8xf32>
    %23 = vector.shape_cast %22 : vector<2x8xf32> to vector<2x8x1xf32>
    %cst_14 = arith.constant 3.125000e-02 : f32
    %24 = vector.broadcast %cst_14 : f32 to vector<2x8x1xf32>
    %25 = arith.mulf %23, %24 : vector<2x8x1xf32>
    %26 = vector.broadcast %25 : vector<2x8x1xf32> to vector<2x8x128xf32>
    %27 = arith.subf %19, %26 : vector<2x8x128xf32>
    %28 = vector.broadcast %4 : vector<1x1x128xf32> to vector<2x8x128xf32>
    %29 = arith.mulf %27, %28 : vector<2x8x128xf32>
    %30 = arith.mulf %29, %29 : vector<2x8x128xf32>
    %cst_15 = arith.constant dense<0.000000e+00> : vector<2x8xf32>
    %31 = vector.multi_reduction <add>, %30, %cst_15 [2] : vector<2x8x128xf32> to vector<2x8xf32>
    %32 = vector.shape_cast %31 : vector<2x8xf32> to vector<2x8x1xf32>
    %cst_16 = arith.constant 3.125000e-02 : f32
    %33 = vector.broadcast %cst_16 : f32 to vector<2x8x1xf32>
    %34 = arith.mulf %32, %33 : vector<2x8x1xf32>
    %cst_17 = arith.constant 9.99999974E-6 : f32
    %35 = vector.broadcast %cst_17 : f32 to vector<2x8x1xf32>
    %36 = arith.addf %34, %35 : vector<2x8x1xf32>
    %37 = math.rsqrt %36 : vector<2x8x1xf32>
    %38 = vector.broadcast %37 : vector<2x8x1xf32> to vector<2x8x128xf32>
    %39 = arith.mulf %29, %38 : vector<2x8x128xf32>
    %40 = vector.shape_cast %20 : vector<1x128xf32> to vector<1x1x128xf32>
    %41 = vector.broadcast %40 : vector<1x1x128xf32> to vector<2x8x128xf32>
    %42 = arith.mulf %39, %41 : vector<2x8x128xf32>
    %43 = vector.shape_cast %21 : vector<1x128xf32> to vector<1x1x128xf32>
    %44 = vector.broadcast %43 : vector<1x1x128xf32> to vector<2x8x128xf32>
    %45 = arith.addf %42, %44 : vector<2x8x128xf32>
    %cst_18 = arith.constant 0.000000e+00 : f32
    %46 = vector.broadcast %cst_18 : f32 to vector<2x8x128xf32>
    %47 = arith.maximumf %45, %46 : vector<2x8x128xf32>
    %c0_19 = arith.constant 0 : index
    %c0_20 = arith.constant 0 : index
    %c0_21 = arith.constant 0 : index
    %48 = vector.load %arg7[%c0_19, %c0_20, %c0_21] : memref<2x128x384xf32, #tpu.memory_space<vmem>>, vector<1x128x384xf32>
    %49 = vector.shape_cast %48 : vector<1x128x384xf32> to vector<128x384xf32>
    "tpu.trace_start"() <{level = 10 : i32, message = "bnd,de->bne"}> : () -> ()
    %cst_22 = arith.constant dense<0.000000e+00> : vector<2x8x384xf32>
    %50 = tpu.matmul %47, %49, %cst_22 {dimension_numbers = #tpu.dot_dimension_numbers<[2], [0], [0, 1], [1], [0, 0, 0, 1, 1, 1], [], []>} : vector<2x8x128xf32>, vector<128x384xf32>, vector<2x8x384xf32> -> vector<2x8x384xf32>
    "tpu.trace_stop"() : () -> ()
    %51 = vector.extract_strided_slice %50 {offsets = [0, 0, 0], sizes = [2, 8, 128], strides = [1, 1, 1]} : vector<2x8x384xf32> to vector<2x8x128xf32>
    %52 = vector.extract_strided_slice %50 {offsets = [0, 0, 128], sizes = [2, 8, 128], strides = [1, 1, 1]} : vector<2x8x384xf32> to vector<2x8x128xf32>
    %53 = vector.extract_strided_slice %50 {offsets = [0, 0, 256], sizes = [2, 8, 128], strides = [1, 1, 1]} : vector<2x8x384xf32> to vector<2x8x128xf32>
    %54 = vector.broadcast %13 : vector<2x8x1xf32> to vector<2x8x128xf32>
    %55 = arith.mulf %53, %54 : vector<2x8x128xf32>
    %cst_23 = arith.constant 0.000000e+00 : f32
    %56 = vector.broadcast %cst_23 : f32 to vector<2x8x128xf32>
    %57 = arith.cmpf oeq, %51, %56 : vector<2x8x128xf32>
    %cst_24 = arith.constant 9.99999997E-7 : f32
    %58 = vector.broadcast %cst_24 : f32 to vector<2x8x128xf32>
    %59 = arith.select %57, %58, %51 : vector<2x8x128xi1>, vector<2x8x128xf32>
    %60 = vector.broadcast %4 : vector<1x1x128xf32> to vector<2x8x128xf32>
    %61 = arith.mulf %59, %60 : vector<2x8x128xf32>
    %cst_25 = arith.constant 0.000000e+00 : f32
    %62 = vector.broadcast %cst_25 : f32 to vector<2x8x128xf32>
    %63 = arith.cmpf oeq, %52, %62 : vector<2x8x128xf32>
    %cst_26 = arith.constant 9.99999997E-7 : f32
    %64 = vector.broadcast %cst_26 : f32 to vector<2x8x128xf32>
    %65 = arith.select %63, %64, %52 : vector<2x8x128xi1>, vector<2x8x128xf32>
    %66 = vector.broadcast %4 : vector<1x1x128xf32> to vector<2x8x128xf32>
    %67 = arith.mulf %65, %66 : vector<2x8x128xf32>
    %68 = arith.mulf %61, %61 : vector<2x8x128xf32>
    %cst_27 = arith.constant dense<0.000000e+00> : vector<2x8xf32>
    %69 = vector.multi_reduction <add>, %68, %cst_27 [2] : vector<2x8x128xf32> to vector<2x8xf32>
    %70 = vector.shape_cast %69 : vector<2x8xf32> to vector<2x8x1xf32>
    %71 = math.rsqrt %70 : vector<2x8x1xf32>
    %72 = vector.broadcast %71 : vector<2x8x1xf32> to vector<2x8x128xf32>
    %73 = arith.mulf %61, %72 : vector<2x8x128xf32>
    %74 = arith.mulf %67, %67 : vector<2x8x128xf32>
    %cst_28 = arith.constant dense<0.000000e+00> : vector<2x8xf32>
    %75 = vector.multi_reduction <add>, %74, %cst_28 [2] : vector<2x8x128xf32> to vector<2x8xf32>
    %76 = vector.shape_cast %75 : vector<2x8xf32> to vector<2x8x1xf32>
    %77 = math.rsqrt %76 : vector<2x8x1xf32>
    %78 = vector.broadcast %77 : vector<2x8x1xf32> to vector<2x8x128xf32>
    %79 = arith.mulf %67, %78 : vector<2x8x128xf32>
    %80 = tpu.concatenate %55, %11 in 2 : vector<2x8x128xf32>, vector<2x8x128xf32> -> vector<2x8x256xf32>
    "tpu.trace_start"() <{level = 10 : i32, message = "bnm,bne->bme"}> : () -> ()
    %cst_29 = arith.constant dense<0.000000e+00> : vector<2x128x256xf32>
    %81 = tpu.matmul %79, %80, %cst_29 {dimension_numbers = #tpu.dot_dimension_numbers<[1], [1], [2], [2], [0, 0, 0, 2, 1, 2], [0], [0]>} : vector<2x8x128xf32>, vector<2x8x256xf32>, vector<2x128x256xf32> -> vector<2x128x256xf32>
    "tpu.trace_stop"() : () -> ()
    "tpu.trace_start"() <{level = 10 : i32, message = "bnm,bme->bne"}> : () -> ()
    %cst_30 = arith.constant dense<0.000000e+00> : vector<2x8x256xf32>
    %82 = tpu.matmul %73, %81, %cst_30 {dimension_numbers = #tpu.dot_dimension_numbers<[2], [1], [1], [2], [0, 0, 0, 1, 1, 2], [0], [0]>} : vector<2x8x128xf32>, vector<2x128x256xf32>, vector<2x8x256xf32> -> vector<2x8x256xf32>
    "tpu.trace_stop"() : () -> ()
    %83 = vector.extract_strided_slice %82 {offsets = [0, 0, 0], sizes = [2, 8, 128], strides = [1, 1, 1]} : vector<2x8x256xf32> to vector<2x8x128xf32>
    %cst_31 = arith.constant 8.000000e+00 : f32
    %84 = vector.broadcast %cst_31 : f32 to vector<2x8x128xf32>
    %85 = arith.mulf %84, %55 : vector<2x8x128xf32>
    %86 = arith.addf %83, %85 : vector<2x8x128xf32>
    %87 = vector.extract_strided_slice %82 {offsets = [0, 0, 128], sizes = [2, 8, 1], strides = [1, 1, 1]} : vector<2x8x256xf32> to vector<2x8x1xf32>
    %cst_32 = arith.constant 8.000000e+00 : f32
    %88 = vector.broadcast %cst_32 : f32 to vector<2x8x1xf32>
    %89 = arith.addf %87, %88 : vector<2x8x1xf32>
    %90 = tpu.reciprocal %89 : vector<2x8x1xf32> -> vector<2x8x1xf32>
    %91 = vector.broadcast %90 : vector<2x8x1xf32> to vector<2x8x128xf32>
    %92 = arith.mulf %86, %91 : vector<2x8x128xf32>
    %93 = arith.addf %92, %47 : vector<2x8x128xf32>
    %cst_33 = arith.constant 5.000000e-01 : f32
    %94 = vector.broadcast %cst_33 : f32 to vector<2x8x128xf32>
    %95 = arith.mulf %93, %94 : vector<2x8x128xf32>
    %c0_34 = arith.constant 0 : index
    %c0_35 = arith.constant 0 : index
    %c0_36 = arith.constant 0 : index
    %96 = vector.load %arg8[%c0_34, %c0_35, %c0_36] : memref<2x1x128xf32, #tpu.memory_space<vmem>>, vector<1x1x128xf32>
    %97 = vector.shape_cast %96 : vector<1x1x128xf32> to vector<1x128xf32>
    %c0_37 = arith.constant 0 : index
    %c0_38 = arith.constant 0 : index
    %c0_39 = arith.constant 0 : index
    %98 = vector.load %arg9[%c0_37, %c0_38, %c0_39] : memref<2x1x128xf32, #tpu.memory_space<vmem>>, vector<1x1x128xf32>
    %99 = vector.shape_cast %98 : vector<1x1x128xf32> to vector<1x128xf32>
    %cst_40 = arith.constant dense<0.000000e+00> : vector<2x8xf32>
    %100 = vector.multi_reduction <add>, %95, %cst_40 [2] : vector<2x8x128xf32> to vector<2x8xf32>
    %101 = vector.shape_cast %100 : vector<2x8xf32> to vector<2x8x1xf32>
    %cst_41 = arith.constant 3.125000e-02 : f32
    %102 = vector.broadcast %cst_41 : f32 to vector<2x8x1xf32>
    %103 = arith.mulf %101, %102 : vector<2x8x1xf32>
    %104 = vector.broadcast %103 : vector<2x8x1xf32> to vector<2x8x128xf32>
    %105 = arith.subf %95, %104 : vector<2x8x128xf32>
    %106 = vector.broadcast %4 : vector<1x1x128xf32> to vector<2x8x128xf32>
    %107 = arith.mulf %105, %106 : vector<2x8x128xf32>
    %108 = arith.mulf %107, %107 : vector<2x8x128xf32>
    %cst_42 = arith.constant dense<0.000000e+00> : vector<2x8xf32>
    %109 = vector.multi_reduction <add>, %108, %cst_42 [2] : vector<2x8x128xf32> to vector<2x8xf32>
    %110 = vector.shape_cast %109 : vector<2x8xf32> to vector<2x8x1xf32>
    %cst_43 = arith.constant 3.125000e-02 : f32
    %111 = vector.broadcast %cst_43 : f32 to vector<2x8x1xf32>
    %112 = arith.mulf %110, %111 : vector<2x8x1xf32>
    %cst_44 = arith.constant 9.99999974E-6 : f32
    %113 = vector.broadcast %cst_44 : f32 to vector<2x8x1xf32>
    %114 = arith.addf %112, %113 : vector<2x8x1xf32>
    %115 = math.rsqrt %114 : vector<2x8x1xf32>
    %116 = vector.broadcast %115 : vector<2x8x1xf32> to vector<2x8x128xf32>
    %117 = arith.mulf %107, %116 : vector<2x8x128xf32>
    %118 = vector.shape_cast %97 : vector<1x128xf32> to vector<1x1x128xf32>
    %119 = vector.broadcast %118 : vector<1x1x128xf32> to vector<2x8x128xf32>
    %120 = arith.mulf %117, %119 : vector<2x8x128xf32>
    %121 = vector.shape_cast %99 : vector<1x128xf32> to vector<1x1x128xf32>
    %122 = vector.broadcast %121 : vector<1x1x128xf32> to vector<2x8x128xf32>
    %123 = arith.addf %120, %122 : vector<2x8x128xf32>
    %cst_45 = arith.constant 0.000000e+00 : f32
    %124 = vector.broadcast %cst_45 : f32 to vector<2x8x128xf32>
    %125 = arith.maximumf %123, %124 : vector<2x8x128xf32>
    %c1 = arith.constant 1 : index
    %c0_46 = arith.constant 0 : index
    %c0_47 = arith.constant 0 : index
    %126 = vector.load %arg7[%c1, %c0_46, %c0_47] : memref<2x128x384xf32, #tpu.memory_space<vmem>>, vector<1x128x384xf32>
    %127 = vector.shape_cast %126 : vector<1x128x384xf32> to vector<128x384xf32>
    "tpu.trace_start"() <{level = 10 : i32, message = "bnd,de->bne"}> : () -> ()
    %cst_48 = arith.constant dense<0.000000e+00> : vector<2x8x384xf32>
    %128 = tpu.matmul %125, %127, %cst_48 {dimension_numbers = #tpu.dot_dimension_numbers<[2], [0], [0, 1], [1], [0, 0, 0, 1, 1, 1], [], []>} : vector<2x8x128xf32>, vector<128x384xf32>, vector<2x8x384xf32> -> vector<2x8x384xf32>
    "tpu.trace_stop"() : () -> ()
    %129 = vector.extract_strided_slice %128 {offsets = [0, 0, 0], sizes = [2, 8, 128], strides = [1, 1, 1]} : vector<2x8x384xf32> to vector<2x8x128xf32>
    %130 = vector.extract_strided_slice %128 {offsets = [0, 0, 128], sizes = [2, 8, 128], strides = [1, 1, 1]} : vector<2x8x384xf32> to vector<2x8x128xf32>
    %131 = vector.extract_strided_slice %128 {offsets = [0, 0, 256], sizes = [2, 8, 128], strides = [1, 1, 1]} : vector<2x8x384xf32> to vector<2x8x128xf32>
    %132 = vector.broadcast %13 : vector<2x8x1xf32> to vector<2x8x128xf32>
    %133 = arith.mulf %131, %132 : vector<2x8x128xf32>
    %cst_49 = arith.constant 0.000000e+00 : f32
    %134 = vector.broadcast %cst_49 : f32 to vector<2x8x128xf32>
    %135 = arith.cmpf oeq, %129, %134 : vector<2x8x128xf32>
    %cst_50 = arith.constant 9.99999997E-7 : f32
    %136 = vector.broadcast %cst_50 : f32 to vector<2x8x128xf32>
    %137 = arith.select %135, %136, %129 : vector<2x8x128xi1>, vector<2x8x128xf32>
    %138 = vector.broadcast %4 : vector<1x1x128xf32> to vector<2x8x128xf32>
    %139 = arith.mulf %137, %138 : vector<2x8x128xf32>
    %cst_51 = arith.constant 0.000000e+00 : f32
    %140 = vector.broadcast %cst_51 : f32 to vector<2x8x128xf32>
    %141 = arith.cmpf oeq, %130, %140 : vector<2x8x128xf32>
    %cst_52 = arith.constant 9.99999997E-7 : f32
    %142 = vector.broadcast %cst_52 : f32 to vector<2x8x128xf32>
    %143 = arith.select %141, %142, %130 : vector<2x8x128xi1>, vector<2x8x128xf32>
    %144 = vector.broadcast %4 : vector<1x1x128xf32> to vector<2x8x128xf32>
    %145 = arith.mulf %143, %144 : vector<2x8x128xf32>
    %146 = arith.mulf %139, %139 : vector<2x8x128xf32>
    %cst_53 = arith.constant dense<0.000000e+00> : vector<2x8xf32>
    %147 = vector.multi_reduction <add>, %146, %cst_53 [2] : vector<2x8x128xf32> to vector<2x8xf32>
    %148 = vector.shape_cast %147 : vector<2x8xf32> to vector<2x8x1xf32>
    %149 = math.rsqrt %148 : vector<2x8x1xf32>
    %150 = vector.broadcast %149 : vector<2x8x1xf32> to vector<2x8x128xf32>
    %151 = arith.mulf %139, %150 : vector<2x8x128xf32>
    %152 = arith.mulf %145, %145 : vector<2x8x128xf32>
    %cst_54 = arith.constant dense<0.000000e+00> : vector<2x8xf32>
    %153 = vector.multi_reduction <add>, %152, %cst_54 [2] : vector<2x8x128xf32> to vector<2x8xf32>
    %154 = vector.shape_cast %153 : vector<2x8xf32> to vector<2x8x1xf32>
    %155 = math.rsqrt %154 : vector<2x8x1xf32>
    %156 = vector.broadcast %155 : vector<2x8x1xf32> to vector<2x8x128xf32>
    %157 = arith.mulf %145, %156 : vector<2x8x128xf32>
    %158 = tpu.concatenate %133, %11 in 2 : vector<2x8x128xf32>, vector<2x8x128xf32> -> vector<2x8x256xf32>
    "tpu.trace_start"() <{level = 10 : i32, message = "bnm,bne->bme"}> : () -> ()
    %cst_55 = arith.constant dense<0.000000e+00> : vector<2x128x256xf32>
    %159 = tpu.matmul %157, %158, %cst_55 {dimension_numbers = #tpu.dot_dimension_numbers<[1], [1], [2], [2], [0, 0, 0, 2, 1, 2], [0], [0]>} : vector<2x8x128xf32>, vector<2x8x256xf32>, vector<2x128x256xf32> -> vector<2x128x256xf32>
    "tpu.trace_stop"() : () -> ()
    "tpu.trace_start"() <{level = 10 : i32, message = "bnm,bme->bne"}> : () -> ()
    %cst_56 = arith.constant dense<0.000000e+00> : vector<2x8x256xf32>
    %160 = tpu.matmul %151, %159, %cst_56 {dimension_numbers = #tpu.dot_dimension_numbers<[2], [1], [1], [2], [0, 0, 0, 1, 1, 2], [0], [0]>} : vector<2x8x128xf32>, vector<2x128x256xf32>, vector<2x8x256xf32> -> vector<2x8x256xf32>
    "tpu.trace_stop"() : () -> ()
    %161 = vector.extract_strided_slice %160 {offsets = [0, 0, 0], sizes = [2, 8, 128], strides = [1, 1, 1]} : vector<2x8x256xf32> to vector<2x8x128xf32>
    %cst_57 = arith.constant 8.000000e+00 : f32
    %162 = vector.broadcast %cst_57 : f32 to vector<2x8x128xf32>
    %163 = arith.mulf %162, %133 : vector<2x8x128xf32>
    %164 = arith.addf %161, %163 : vector<2x8x128xf32>
    %165 = vector.extract_strided_slice %160 {offsets = [0, 0, 128], sizes = [2, 8, 1], strides = [1, 1, 1]} : vector<2x8x256xf32> to vector<2x8x1xf32>
    %cst_58 = arith.constant 8.000000e+00 : f32
    %166 = vector.broadcast %cst_58 : f32 to vector<2x8x1xf32>
    %167 = arith.addf %165, %166 : vector<2x8x1xf32>
    %168 = tpu.reciprocal %167 : vector<2x8x1xf32> -> vector<2x8x1xf32>
    %169 = vector.broadcast %168 : vector<2x8x1xf32> to vector<2x8x128xf32>
    %170 = arith.mulf %164, %169 : vector<2x8x128xf32>
    %171 = arith.addf %170, %125 : vector<2x8x128xf32>
    %cst_59 = arith.constant 5.000000e-01 : f32
    %172 = vector.broadcast %cst_59 : f32 to vector<2x8x128xf32>
    %173 = arith.mulf %171, %172 : vector<2x8x128xf32>
    %c1_60 = arith.constant 1 : index
    %c0_61 = arith.constant 0 : index
    %c0_62 = arith.constant 0 : index
    %174 = vector.load %arg8[%c1_60, %c0_61, %c0_62] : memref<2x1x128xf32, #tpu.memory_space<vmem>>, vector<1x1x128xf32>
    %175 = vector.shape_cast %174 : vector<1x1x128xf32> to vector<1x128xf32>
    %c1_63 = arith.constant 1 : index
    %c0_64 = arith.constant 0 : index
    %c0_65 = arith.constant 0 : index
    %176 = vector.load %arg9[%c1_63, %c0_64, %c0_65] : memref<2x1x128xf32, #tpu.memory_space<vmem>>, vector<1x1x128xf32>
    %177 = vector.shape_cast %176 : vector<1x1x128xf32> to vector<1x128xf32>
    %cst_66 = arith.constant dense<0.000000e+00> : vector<2x8xf32>
    %178 = vector.multi_reduction <add>, %173, %cst_66 [2] : vector<2x8x128xf32> to vector<2x8xf32>
    %179 = vector.shape_cast %178 : vector<2x8xf32> to vector<2x8x1xf32>
    %cst_67 = arith.constant 3.125000e-02 : f32
    %180 = vector.broadcast %cst_67 : f32 to vector<2x8x1xf32>
    %181 = arith.mulf %179, %180 : vector<2x8x1xf32>
    %182 = vector.broadcast %181 : vector<2x8x1xf32> to vector<2x8x128xf32>
    %183 = arith.subf %173, %182 : vector<2x8x128xf32>
    %184 = vector.broadcast %4 : vector<1x1x128xf32> to vector<2x8x128xf32>
    %185 = arith.mulf %183, %184 : vector<2x8x128xf32>
    %186 = arith.mulf %185, %185 : vector<2x8x128xf32>
    %cst_68 = arith.constant dense<0.000000e+00> : vector<2x8xf32>
    %187 = vector.multi_reduction <add>, %186, %cst_68 [2] : vector<2x8x128xf32> to vector<2x8xf32>
    %188 = vector.shape_cast %187 : vector<2x8xf32> to vector<2x8x1xf32>
    %cst_69 = arith.constant 3.125000e-02 : f32
    %189 = vector.broadcast %cst_69 : f32 to vector<2x8x1xf32>
    %190 = arith.mulf %188, %189 : vector<2x8x1xf32>
    %cst_70 = arith.constant 9.99999974E-6 : f32
    %191 = vector.broadcast %cst_70 : f32 to vector<2x8x1xf32>
    %192 = arith.addf %190, %191 : vector<2x8x1xf32>
    %193 = math.rsqrt %192 : vector<2x8x1xf32>
    %194 = vector.broadcast %193 : vector<2x8x1xf32> to vector<2x8x128xf32>
    %195 = arith.mulf %185, %194 : vector<2x8x128xf32>
    %196 = vector.shape_cast %175 : vector<1x128xf32> to vector<1x1x128xf32>
    %197 = vector.broadcast %196 : vector<1x1x128xf32> to vector<2x8x128xf32>
    %198 = arith.mulf %195, %197 : vector<2x8x128xf32>
    %199 = vector.shape_cast %177 : vector<1x128xf32> to vector<1x1x128xf32>
    %200 = vector.broadcast %199 : vector<1x1x128xf32> to vector<2x8x128xf32>
    %201 = arith.addf %198, %200 : vector<2x8x128xf32>
    %cst_71 = arith.constant 0.000000e+00 : f32
    %202 = vector.broadcast %cst_71 : f32 to vector<2x8x128xf32>
    %203 = arith.maximumf %201, %202 : vector<2x8x128xf32>
    %204 = vector.extract_strided_slice %203 {offsets = [0, 0, 0], sizes = [2, 8, 32], strides = [1, 1, 1]} : vector<2x8x128xf32> to vector<2x8x32xf32>
    %c0_72 = arith.constant 0 : index
    %c0_73 = arith.constant 0 : index
    %c0_74 = arith.constant 0 : index
    %205 = vector.load %arg10[%c0_72, %c0_73, %c0_74] : memref<2x8x32xf32, #tpu.memory_space<vmem>>, vector<2x8x32xf32>
    tpu.vector_store %arg10[%c0_72, %c0_73, %c0_74], %204 {strides = array<i32>} : memref<2x8x32xf32, #tpu.memory_space<vmem>>, vector<2x8x32xf32>,
    return
  }
  func.func @transform_0(%arg0: i32) -> (i32, i32, i32) {
    %c0_i32 = arith.constant 0 : i32
    %c0_i32_0 = arith.constant 0 : i32
    %c0_i32_1 = arith.constant 0 : i32
    return %arg0, %c0_i32, %c0_i32_0 : i32, i32, i32
  }
  func.func @transform_1(%arg0: i32) -> (i32, i32, i32) {
    %c0_i32 = arith.constant 0 : i32
    %c0_i32_0 = arith.constant 0 : i32
    %c0_i32_1 = arith.constant 0 : i32
    return %arg0, %c0_i32, %c0_i32_0 : i32, i32, i32
  }
  func.func @transform_2(%arg0: i32) -> (i32, i32) {
    %c0_i32 = arith.constant 0 : i32
    %c0_i32_0 = arith.constant 0 : i32
    %c0_i32_1 = arith.constant 0 : i32
    return %c0_i32, %c0_i32_0 : i32, i32
  }
  func.func @transform_3(%arg0: i32) -> (i32, i32) {
    %c0_i32 = arith.constant 0 : i32
    %c0_i32_0 = arith.constant 0 : i32
    %c0_i32_1 = arith.constant 0 : i32
    return %c0_i32, %c0_i32_0 : i32, i32
  }
  func.func @transform_4(%arg0: i32) -> (i32, i32) {
    %c0_i32 = arith.constant 0 : i32
    %c0_i32_0 = arith.constant 0 : i32
    %c0_i32_1 = arith.constant 0 : i32
    return %c0_i32, %c0_i32_0 : i32, i32
  }
  func.func @transform_5(%arg0: i32) -> (i32, i32) {
    %c0_i32 = arith.constant 0 : i32
    %c0_i32_0 = arith.constant 0 : i32
    %c0_i32_1 = arith.constant 0 : i32
    return %c0_i32, %c0_i32_0 : i32, i32
  }
  func.func @transform_6(%arg0: i32) -> (i32, i32, i32) {
    %c0_i32 = arith.constant 0 : i32
    %c0_i32_0 = arith.constant 0 : i32
    %c0_i32_1 = arith.constant 0 : i32
    %c0_i32_2 = arith.constant 0 : i32
    return %c0_i32, %c0_i32_0, %c0_i32_1 : i32, i32, i32
  }
  func.func @transform_7(%arg0: i32) -> (i32, i32, i32) {
    %c0_i32 = arith.constant 0 : i32
    %c0_i32_0 = arith.constant 0 : i32
    %c0_i32_1 = arith.constant 0 : i32
    %c0_i32_2 = arith.constant 0 : i32
    return %c0_i32, %c0_i32_0, %c0_i32_1 : i32, i32, i32
  }
  func.func @transform_8(%arg0: i32) -> (i32, i32, i32) {
    %c0_i32 = arith.constant 0 : i32
    %c0_i32_0 = arith.constant 0 : i32
    %c0_i32_1 = arith.constant 0 : i32
    %c0_i32_2 = arith.constant 0 : i32
    return %c0_i32, %c0_i32_0, %c0_i32_1 : i32, i32, i32
  }
  func.func @transform_9(%arg0: i32) -> (i32, i32, i32) {
    %c0_i32 = arith.constant 0 : i32
    %c0_i32_0 = arith.constant 0 : i32
    %c0_i32_1 = arith.constant 0 : i32
    return %arg0, %c0_i32, %c0_i32_0 : i32, i32, i32
  }
}

</mosaic_0001>

<bundles_post_ra>
// kernel: tpu_custom_call.1
= control target key start
LH: loop header
LB: loop body
LE: loop exit
PB: predicated region body
PF: predicated region fallthrough
CT: control target
= control target key end

     0   :  { %14 = vsyncpa [#allocation3], 0  ;;  %s3629_s0 = inlined_call_operand.vmem [shape: f32[4,8,8], index: 0, kind: input, shape index: {}]   ;;  %s3630_s1 = inlined_call_operand.vmem [shape: f32[4,8,1], index: 1, kind: input, shape index: {}]   ;;  %s3631_s2 = inlined_call_operand.vmem [shape: f32[8,128], index: 2, kind: input, shape index: {}]   ;;  %s3632_s3 = inlined_call_operand.vmem [shape: f32[1,128], index: 3, kind: input, shape index: {}]   ;;  %s3633_s4 = inlined_call_operand.vmem [shape: f32[1,128], index: 4, kind: input, shape index: {}]   ;;  %s3634_s5 = inlined_call_operand.vmem [shape: f32[1,128], index: 5, kind: input, shape index: {}]   ;;  %s3635_s6 = inlined_call_operand.hbm [shape: f32[2,128,384], index: 6, kind: input, shape index: {}]   ;;  %s3636_s7 = inlined_call_operand.vmem [shape: f32[2,1,128], index: 7, kind: input, shape index: {}]   ;;  %s3637_s8 = inlined_call_operand.vmem [shape: f32[2,1,128], index: 8, kind: input, shape index: {}]   ;;  %s3638_s9 = inlined_call_operand.hbm [shape: f32[4,8,32], index: 9, kind: output, shape index: {}]  }
   0x1   :  { %15 = vsyncpa [#allocation4], 0 }
   0x2   :  { %17 = vsyncpa [#allocation4 + $0x1], 0  ;;  %s3203_s30 = smov 0   ;;  %s3205_s10 = smov 0  }
   0x3   :  { %s3207_s11 = smov 0   ;;  %s3209_s12 = smov 0  }
   0x4 LB: > { %s3224_s13 = sadd.s32 4294967295, %s3142_s12   ;;  %s2485_s14 = sadd.s32 4294967294, %s3142_s12   ;;  %s3142_s12 = sphi %s3209_s12, %s3654_s12   ;;  %s3138_s11 = sphi %s3207_s11, %s3653_s11   ;;  %s3134_s10 = sphi %s3205_s10, %s3652_s10   ;;  %s3130_s30 = sphi %s3203_s30, %s3651_s30  }
   0x5   : > { %s3228_s15 = sadd.s32 1, %s3142_s12   ;;  %s229_s16 = sadd.s32 1, %s3138_s11 }
   0x6   : > { %s226_s17 = ssub.s32 %s3142_s12, %s3228_s15  ;;  %p239_p0 = scmp.ne.s32.totalorder %s3138_s11, %s3134_s10 }
   0x7   : > { %p227_p1 = scmp.eq.s32.totalorder %s226_s17, 0  ;;  %p240_p2 = scmp.eq.s32.totalorder %s3224_s13, 1 }
   0x8   : > { %p245_p3 = scmp.ne.s32.totalorder %s3134_s10, %s3130_s30  ;;  %p246_p4 = scmp.eq.s32.totalorder %s2485_s14, 1 }
   0x9   : > { %s3239_s18 = scalar_select %p227_p1, %s3138_s11, %s229_s16  }
   0xa   : > { %p3241_p5 = por %p240_p2, %p239_p0  ;;  %p3245_p6 = por %p246_p4, %p245_p3 }
   0xb   : > { %p2486_p7 = scmp.ge.s32.totalorder %s3142_s12, 1  ;;  %p253_p8 = scmp.lt.s32.totalorder %s3142_s12, 3 }
   0xc   : > { %s3642_s19 = scalar_select %p3241_p5, 1, 0 }
   0xd   : > { %s3643_s20 = scalar_select %p3245_p6, 1, 0 }
   0xe   : > { %p3639_p9 = scmp.eq.s32.totalorder %s3224_s13, 0  ;;  %p3252_p10 = pnand %p2486_p7, %p253_p8 }
   0xf   : > { %s3144_s22 = smov [#allocation2]   ;;  %s3048_s27 = scalar_lea.hbm %s3635_s6, 12288 }
  0x10   : > { %s3644_s21 = scalar_select %p3252_p10, 1, 0 }
  0x11   : > { %s277_s23 = sshll.u32 %s3144_s22, 4  ;;  %p2959_p11 = pneg %p3252_p10  ;;  %s278_s23 = int_to_ptr.vmem [resolvable:$true] %s277_s23 }
  0x12   : > { %p3049_p13 = scmp.ne.s32.totalorder %s3635_s6, %s3048_s27  ;;  %p3055_p3 = scmp.lt.u32.totalorder %s3048_s27, %s3635_s6 }
  0x13   : > { %p3260_p12 = pnand %p3639_p9, %p2959_p11 }
  0x15   : > { %p3050_p0 = pneg %p3260_p12 }
  0x17   : > { %p3051_p1 = pnand %p3050_p0, %p3049_p13 }
  0x19   : > { %p3052_p2 = pneg %p3051_p1 }
  0x1b   : > { %p3057_p4 = pnand %p3055_p3, %p3052_p2 }
  0x1d   : > { %3060 = shalt.err (!%p3057_p4)
}
  0x1e   : > { %s3061_s17 = scalar_lea.vmem %s278_s23, 12288  ;;  %p3069_p9 = scmp.lt.s32.totalorder %s278_s23, %s278_s23 }
  0x1f   : > { %p3062_p7 = scmp.ne.s32.totalorder %s278_s23, %s3061_s17  ;;  %p3070_p6 = scmp.lt.s32.totalorder %s3061_s17, %s3061_s17 }
  0x21   : > { %p3064_p8 = pnand %p3062_p7, %p3050_p0  ;;  %p3071_p5 = por %p3070_p6, %p3069_p9 }
  0x23   : > { %p3065_p11 = pneg %p3064_p8 }
  0x25   : > { %p3072_p10 = pnand %p3071_p5, %p3065_p11 }
  0x27   : > { %3075 = shalt.err (!%p3072_p10)
}
  0x28   : > { %s3145_s22 = smov 384   ;;  %s3146_s25 = smov 24  }
  0x29   : > { %2962 = dma.hbm_to_vmem [thread:$0]  (!%p3260_p12), %s3635_s6, 12288, %s278_s23, [#allocation3], %s3145_s22, %s3145_s22, %s3146_s25  }
  0x2a   : > { %p3646_p13 = scmp.ne.s32.totalorder %s3644_s21, 0 }
  0x2b   : > { %p3647_p1 = scmp.eq.s32.totalorder (!%p3646_p13), %s3224_s13, 0 }
  0x2c   : > { %317 = sbr.rel (%p3646_p13) target bundleno = 3523 (0xdc3), region = 56 }
  0x33   : > { %3121 = dma.done.wait (%p3647_p1), [#allocation3], 12288   ;;  %p3648_p0 = pmov %p3647_p1 }
  0x34   : > { %s2492_s27 = sshll.u32 %s3224_s13, 1  ;;  %vm391_vm0 = vcmask 64512   ;;  %v383_v0 = vld [vmem:[%s3631_s2] sm:$0xff]  ;;  %v3147_v8 = vmov 0.0   ;;  %v518_v9 = vld [vmem:[#allocation2 + $0x8] sm:$0xff]  ;;  %v520_v13 = vld [vmem:[#allocation2 + $0x18] sm:$0xff]  ;;  %v371_v30 = vlaneseq }
  0x35   : > { %3123 = vsyncadd (%p3648_p0), [#allocation3], 4294955008  ;;  %p359_p5 = scmp.lt.s32.totalorder %s2492_s27, 3  ;;  %2622 = vmatprep.subr.mxu0 %v383_v0  ;;  %v2498_v3 = vld [vmem:[%s3632_s3] ss:$0 sm:$0xff]  ;;  %629 = vmatprep.mubr.f32.mxu1 %v3147_v8  ;;  %v524_v14 = vld [vmem:[#allocation2 + $0x38] sm:$0xff] }
  0x36   : > { %2623 = vmatpush3.msra.mxu0 %v383_v0  ;;  %v521_v10 = vld [vmem:[#allocation2 + $0x20] sm:$0xff]  ;;  %v527_v15 = vld [vmem:[#allocation2 + $0x50] sm:$0xff]  ;;  %v522_v19 = vld [vmem:[#allocation2 + $0x28] sm:$0xff]  ;;  %v3304_v31 = vand.u32 127, %v371_v30  ;;  %s355_s26 = sand.u32 1, %s3134_s10   ;;  %vm2382_vm11 = vcmask 261120  }
  0x37   : > { %s3656_s27 = smov (!%p359_p5, %s2492_s27), 3  ;;  %v517_v11 = vld [vmem:[#allocation2] sm:$0xff]  ;;  %v2697_v12 = vpack.c.bf16 %v521_v10, %v518_v9  ;;  %v2701_v17 = vpack.c.bf16 %v527_v15, %v524_v14  ;;  %v519_v18 = vld [vmem:[#allocation2 + $0x10] sm:$0xff]  ;;  %v526_v22 = vld [vmem:[#allocation2 + $0x48] sm:$0xff]  ;;  %s2491_s29 = sshll.u32 %s355_s26, 4 }
  0x38   : > { %s2493_s24 = sshll.u32 %s3656_s27, 3  ;;  %v2699_v16 = vpack.c.bf16 %v520_v13, %v517_v11  ;;  %v523_v20 = vld [vmem:[#allocation2 + $0x30] sm:$0xff]  ;;  %v2729_v21 = vpack.c.bf16 %v522_v19, %v519_v18  ;;  %v530_v23 = vld [vmem:[#allocation2 + $0x68] sm:$0xff]  ;;  %v533_v24 = vld [vmem:[#allocation2 + $0x80] sm:$0xff]  ;;  %vm373_vm1 = vcmp.lt.s32.totalorder %v3304_v31, 32  ;;  %vm376_vm4 = vcmp.eq.s32.totalorder %v3304_v31, 0 }
  0x39   : > { %s362_s21 = scalar_lea.vmem %s3629_s0, %s2493_s24  ;;  %2698 = vmatprep.subr.bf16.mxu1 %v2697_v12  ;;  %v2703_v25 = vpack.c.bf16 %v526_v22, %v523_v20  ;;  %v525_v26 = vld [vmem:[#allocation2 + $0x40] sm:$0xff]  ;;  %v528_v27 = vld [vmem:[#allocation2 + $0x58] sm:$0xff]  ;;  %v2705_v28 = vpack.c.bf16 %v533_v24, %v530_v23  ;;  %v3308_v34 = vsel %vm373_vm1, 1.0, %v3147_v8  ;;  %v539_v47 = vld [vmem:[#allocation2 + $0xb0] sm:$0xff]  ;;  %s368_s14 = scalar_lea.vmem %s3630_s1, %s2493_s24 }
  0x3a   : > { %v379_v1 = vld [vmem:[%s362_s21] sm:$0xff]  ;;  %v380_v2 = vld [vmem:[%s362_s21 + $0x8] sm:$0xff]  ;;  %2700 = vmatpush1.bf16.msra.mxu1 %v2699_v16  ;;  %2730 = vmatprep.subr.bf16.mxu0 %v2729_v21  ;;  %v2733_v29 = vpack.c.bf16 %v528_v27, %v525_v26  ;;  %v532_v44 = vld [vmem:[#allocation2 + $0x78] sm:$0xff]  ;;  %s2582_s21 = sshll.u32 %s3224_s13, 8  ;;  %s3588_s22 = scalar_lea.sflag [#allocation4], %s355_s26 }
  0x3b   : > { %2624 = vmatprep.mubr.msk.f32.mxu0 %vm391_vm0, %v379_v1  ;;  %2702 = vmatprep.subr.bf16.mxu1 %v2701_v17  ;;  %v529_v43 = vld [vmem:[#allocation2 + $0x60] sm:$0xff]  ;;  %v536_v46 = vld [vmem:[#allocation2 + $0x98] sm:$0xff]  ;;  %v531_v48 = vld [vmem:[#allocation2 + $0x70] sm:$0xff]  ;;  %s3584_s17 = scalar_lea.hbm %s3638_s9, %s2582_s21  ;;  %p3649_p9 = scmp.ne.s32.totalorder %s3642_s19, 0 }
  0x3c   : > { %2625 = vmatmul.mubr.msk.f32.vlgmr.msra.gmra.mrb[0].mxu0 %vm391_vm0, %v380_v2  ;;  %v2707_v45 = vpack.c.bf16 %v532_v44, %v529_v43  ;;  %v2709_v49 = vpack.c.bf16 %v539_v47, %v536_v46  ;;  %v534_v50 = vld [vmem:[#allocation2 + $0x88] sm:$0xff]  ;;  %v535_v51 = vld [vmem:[#allocation2 + $0x90] sm:$0xff]  ;;  %v545_v56 = vld [vmem:[#allocation2 + $0xe0] sm:$0xff]  ;;  %s3150_s13 = smov [#allocation5]  }
  0x3d   : > { %2732 = vmatpush3.bf16.msra.mxu0 %v2729_v21  ;;  %v538_v52 = vld [vmem:[#allocation2 + $0xa8] sm:$0xff]  ;;  %v2737_v53 = vpack.c.bf16 %v534_v50, %v531_v48  ;;  %v537_v57 = vld [vmem:[#allocation2 + $0xa0] sm:$0xff]  ;;  %v540_v59 = vld [vmem:[#allocation2 + $0xb8] sm:$0xff]  ;;  %s3080_s28 = sshll.u32 %s3150_s13, 4  ;;  %s3081_s28 = int_to_ptr.vmem [resolvable:$false] %s3080_s28 }
  0x3e   : > { %2734 = vmatprep.subr.bf16.mxu0 %v2733_v29  ;;  %2704 = vmatpush1.bf16.msra.mxu1 %v2703_v25  ;;  %v2711_v54 = vpack.c.bf16 %v538_v52, %v535_v51  ;;  %v542_v55 = vld [vmem:[#allocation2 + $0xc8] sm:$0xff]  ;;  %v541_v60 = vld [vmem:[#allocation2 + $0xc0] sm:$0xff]  ;;  %v544_v61 = vld [vmem:[#allocation2 + $0xd8] sm:$0xff]  ;;  %v2741_v62 = vpack.c.bf16 %v540_v59, %v537_v57  ;;  %s3082_s23 = scalar_lea.vmem %s3081_s28, 512 }
  0x3f   : > { %2706 = vmatprep.subr.bf16.mxu1 %v2705_v28  ;;  %v2713_v58 = vpack.c.bf16 %v545_v56, %v542_v55  ;;  %v2715_v63 = vpack.c.bf16 %v544_v61, %v541_v60  ;;  %v548_v0 = vld [vmem:[#allocation2 + $0xf8] sm:$0xff]  ;;  %v551_v1 = vld [vmem:[#allocation2 + $0x110] sm:$0xff]  ;;  %v554_v10 = vld [vmem:[#allocation2 + $0x128] sm:$0xff] }
  0x40   : > { %v543_v2 = vld [vmem:[#allocation2 + $0xd0] sm:$0xff]  ;;  %v557_v11 = vld [vmem:[#allocation2 + $0x140] sm:$0xff]  ;;  %v552_v14 = vld [vmem:[#allocation2 + $0x118] sm:$0xff] }
  0x41   : > { %2736 = vmatpush3.bf16.msra.mxu0 %v2733_v29  ;;  %v549_v12 = vld [vmem:[#allocation2 + $0x100] sm:$0xff]  ;;  %v2721_v13 = vpack.c.bf16 %v557_v11, %v554_v10  ;;  %v556_v16 = vld [vmem:[#allocation2 + $0x138] sm:$0xff]  ;;  %v563_v20 = vld [vmem:[#allocation2 + $0x170] sm:$0xff] }
  0x42   : > { %2708 = vmatpush1.bf16.msra.mxu1 %v2707_v45  ;;  %2738 = vmatprep.subr.bf16.mxu0 %v2737_v53  ;;  %v553_v15 = vld [vmem:[#allocation2 + $0x120] sm:$0xff]  ;;  %v2749_v17 = vpack.c.bf16 %v552_v14, %v549_v12  ;;  %v560_v19 = vld [vmem:[#allocation2 + $0x158] sm:$0xff]  ;;  %v555_v21 = vld [vmem:[#allocation2 + $0x130] sm:$0xff] }
  0x43   : > { %2710 = vmatprep.subr.bf16.mxu1 %v2709_v49  ;;  %v2723_v18 = vpack.c.bf16 %v556_v16, %v553_v15  ;;  %v2725_v22 = vpack.c.bf16 %v563_v20, %v560_v19  ;;  %v558_v23 = vld [vmem:[#allocation2 + $0x148] sm:$0xff]  ;;  %v559_v24 = vld [vmem:[#allocation2 + $0x150] sm:$0xff]  ;;  %v561_v28 = vld [vmem:[#allocation2 + $0x160] sm:$0xff] }
  0x44   : > { %v562_v25 = vld [vmem:[#allocation2 + $0x168] sm:$0xff]  ;;  %v2753_v26 = vpack.c.bf16 %v558_v23, %v555_v21  ;;  %v564_v29 = vld [vmem:[#allocation2 + $0x178] sm:$0xff]  ;;  %v2502_v44 = vld [vmem:[%s3634_s5] ss:$0 sm:$0xff] }
  0x45   : > { %2740 = vmatpush3.bf16.msra.mxu0 %v2737_v53  ;;  %v2727_v27 = vpack.c.bf16 %v562_v25, %v559_v24  ;;  %v2757_v30 = vpack.c.bf16 %v564_v29, %v561_v28  ;;  %v2538_v31 = vld [vmem:[%s3637_s8] ss:$0 sm:$0xff] }
  0x46   : > { %2712 = vmatpush1.bf16.msra.mxu1 %v2711_v54  ;;  %2742 = vmatprep.subr.bf16.mxu0 %v2741_v62 }
  0x47   : > { %2714 = vmatprep.subr.bf16.mxu1 %v2713_v58 }
  0x49   : > { %2744 = vmatpush3.bf16.msra.mxu0 %v2741_v62 }
  0x4a   : > { %2716 = vmatpush1.bf16.msra.mxu1 %v2715_v63 }
 0x10f   : > { %v2626_v4 = vpop.f32.mrb[0].mxu0 }
 0x110   : > { %v464_v5 = vpop.f32.mrb[1].mxu0  ;;  %v470_v7 = vadd.f32 %v2626_v4, %v2498_v3  ;;  %v546_v4 = vld [vmem:[#allocation2 + $0xe8] sm:$0xff] }
 0x111   : > { %v465_v6 = vadd.f32 %v2498_v3, %v464_v5  ;;  %v2717_v3 = vpack.c.bf16 %v551_v1, %v548_v0  ;;  %v547_v5 = vld [vmem:[#allocation2 + $0xf0] sm:$0xff]  ;;  %v382_v0 = vld [vmem:[%s368_s14 + $0x8] sm:$0xff]  ;;  %v381_v1 = vld [vmem:[%s368_s14] sm:$0xff]  ;;  %s357_s14 = scalar_lea.vmem [#allocation5], %s2491_s29 }
 0x112   : > { %s2399_s27 = sshll.u32 %s357_s14, 4  ;;  %s3586_s27 = int_to_ptr.vmem [resolvable:$true] %s2399_s27 }
 0x113   : > { %475 = vadd.xlane.f32.xlu0 %v465_v6  ;;  %2718 = vmatprep.subr.bf16.mxu1 %v2717_v3  ;;  %s3076_s25 = scalar_lea.vmem %s3586_s27, 256  ;;  %p3083_p2 = scmp.lt.s32.totalorder %s3586_s27, %s3081_s28 }
 0x114   : > { %p3077_p6 = scmp.ne.s32.totalorder %s3586_s27, %s3076_s25  ;;  %p3084_p3 = scmp.lt.s32.totalorder %s3082_s23, %s3076_s25 }
 0x116   : > { %p3078_p10 = pnand %p3077_p6, %p3649_p9  ;;  %p3085_p4 = por %p3084_p3, %p3083_p2 }
 0x117   : > { %477 = vadd.xlane.f32.xlu0 %v470_v7 }
 0x118   : > { %p3079_p12 = pneg %p3078_p10 }
 0x11a   : > { %p3086_p7 = pnand %p3085_p4, %p3079_p12 }
 0x1a0   : > { %v476_v32 = vpop.xlane.xlu0 %475 }
 0x1a1   : > { %v479_v33 = vmul.f32 0.03125, %v476_v32 }
 0x1a3   : > { %v481_v35 = vsub.f32 %v465_v6, %v479_v33  ;;  %v550_v6 = vld [vmem:[#allocation2 + $0x108] sm:$0xff] }
 0x1a4   : > { %v478_v36 = vpop.xlane.xlu0 %477  ;;  %v2719_v9 = vpack.c.bf16 %v550_v6, %v547_v5 }
 0x1a5   : > { %v480_v37 = vmul.f32 0.03125, %v478_v36  ;;  %v3311_v38 = vmul.f32 %v3308_v34, %v481_v35 }
 0x1a6   : > { %2720 = vmatpush1.bf16.msra.mxu1 %v2719_v9 }
 0x1a7   : > { %v482_v39 = vsub.f32 %v470_v7, %v480_v37  ;;  %v485_v40 = vmul.f32 %v3311_v38, %v3311_v38  ;;  %v2745_v7 = vpack.c.bf16 %v546_v4, %v543_v2  ;;  %2722 = vmatprep.subr.bf16.mxu1 %v2721_v13  ;;  %v3149_v2 = vmov 1.0  }
 0x1a9   : > { %487 = vadd.xlane.f32.xlu1 %v485_v40  ;;  %v3316_v41 = vmul.f32 %v3308_v34, %v482_v39  ;;  %2746 = vmatprep.subr.bf16.mxu0 %v2745_v7 }
 0x1aa   : > { %2748 = vmatpush3.bf16.msra.mxu0 %v2745_v7  ;;  %2724 = vmatpush1.bf16.msra.mxu1 %v2723_v18 }
 0x1ab   : > { %v486_v42 = vmul.f32 %v3316_v41, %v3316_v41  ;;  %2750 = vmatprep.subr.bf16.mxu0 %v2749_v17  ;;  %2726 = vmatprep.subr.bf16.mxu1 %v2725_v22 }
 0x1ad   : > { %489 = vadd.xlane.f32.xlu1 %v486_v42  ;;  %v2501_v42 = vld [vmem:[%s3633_s4] ss:$0 sm:$0xff] }
 0x1ae   : > { %2752 = vmatpush3.bf16.msra.mxu0 %v2749_v17  ;;  %2728 = vmatpush1.bf16.msra.mxu1 %v2727_v27 }
 0x1af   : > { %2754 = vmatprep.subr.bf16.mxu0 %v2753_v26  ;;  %2520 = vmatprep.subr.msk.mxu1 %vm376_vm4, %v3149_v2 }
 0x1b2   : > { %2756 = vmatpush3.bf16.msra.mxu0 %v2753_v26 }
 0x1b3   : > { %2758 = vmatprep.subr.bf16.mxu0 %v2757_v30 }
 0x1b6   : > { %2760 = vmatpush3.bf16.msra.mxu0 %v2757_v30 }
 0x1b7   : > { %2503 = vmatprep.subr.msk.mxu0 %vm376_vm4, %v3149_v2 }
 0x236   : > { %v488_v32 = vpop.xlane.xlu1 %487 }
 0x237   : > { %v491_v33 = vmul.f32 0.03125, %v488_v32 }
 0x239   : > { %v493_v35 = vadd.f32 1e-05, %v491_v33 }
 0x23a   : > { %v490_v36 = vpop.xlane.xlu1 %489 }
 0x23b   : > { %3012 = vrsqrt.f32 %v493_v35  ;;  %v492_v37 = vmul.f32 0.03125, %v490_v36 }
 0x23d   : > { %v494_v39 = vadd.f32 1e-05, %v492_v37 }
 0x23f   : > { %3014 = vrsqrt.f32 %v494_v39 }
 0x245   : > { %v3013_v40 = vpop.eup %3012 }
 0x246   : > { %v497_v43 = vmul.f32 %v3013_v40, %v3311_v38 }
 0x248   : > { %v505_v45 = vmul.f32 %v2501_v42, %v497_v43 }
 0x249   : > { %v3015_v46 = vpop.eup %3014 }
 0x24a   : > { %v513_v47 = vadd.f32 %v2502_v44, %v505_v45  ;;  %v498_v48 = vmul.f32 %v3015_v46, %v3316_v41  ;;  %v3148_v41 = vmov 0  }
 0x24b   : > { %3011 = vset.pattern.permute.xlu1 %v3148_v41  ;;  %3010 = vset.pattern.permute.xlu0 %v3148_v41 }
 0x24c   : > { %v3328_v49 = vmax.f32 %v513_v47, 0.0  ;;  %v506_v50 = vmul.f32 %v2501_v42, %v498_v48 }
 0x24e   : > { %630 = vmatmul.mubr.f32.vlgmr.msra.gmra.mrb[0].mxu1 %v3328_v49  ;;  %2659 = vmatprep.mubr.f32.mxu0 %v3328_v49  ;;  %v514_v51 = vadd.f32 %v2502_v44, %v506_v50 }
 0x24f   : > { %635 = vmatprep.mubr.f32.mxu1 %v3147_v8 }
 0x250   : > { %v3333_v38 = vmax.f32 %v514_v51, 0.0 }
 0x252   : > { %636 = vmatmul.mubr.f32.gmra.mrb[2].mxu1 %v3333_v38  ;;  %2660 = vmatmul.mubr.f32.vlgmr.msra.gmra.mrb[2].mxu0 %v3333_v38 }
 0x253   : > { %905 = vmatprep.mubr.f32.mxu0 %v3147_v8  ;;  %1146 = vmatprep.mubr.f32.mxu1 %v3147_v8 }
 0x321   : > { %v631_v52 = vpop.f32.mrb[0].mxu1 }
 0x322   : > { %v633_v53 = vpop.f32.mrb[1].mxu1  ;;  %vm729_vm5 = vcmp.eq.f32.partialorder %v631_v52, 0.0 }
 0x323   : > { %vm735_vm2 = vcmp.eq.f32.partialorder %v633_v53, 0.0  ;;  %v731_v14 = vsel %vm729_vm5, 1e-06, %v631_v52 }
 0x324   : > { %v737_v54 = vsel %vm735_vm2, 1e-06, %v633_v53  ;;  %v3366_v15 = vmul.f32 %v3308_v34, %v731_v14 }
 0x325   : > { %v739_v55 = vmul.f32 %v3308_v34, %v737_v54  ;;  %v637_v56 = vpop.f32.mrb[2].mxu1  ;;  %v2661_v57 = vpop.f32.mrb[2].mxu0 }
 0x326   : > { %v639_v58 = vpop.f32.mrb[3].mxu1  ;;  %v708_v59 = vpop.f32.mrb[3].mxu0  ;;  %vm730_vm6 = vcmp.eq.f32.partialorder %v637_v56, 0.0  ;;  %v741_v16 = vmul.f32 %v3366_v15, %v3366_v15 }
 0x327   : > { %vm736_vm3 = vcmp.eq.f32.partialorder %v639_v58, 0.0  ;;  %v751_v60 = vmul.f32 %v739_v55, %v739_v55  ;;  %v732_v17 = vsel %vm730_vm6, 1e-06, %v637_v56 }
 0x328   : > { %v738_v61 = vsel %vm736_vm3, 1e-06, %v639_v58  ;;  %v3371_v18 = vmul.f32 %v3308_v34, %v732_v17 }
 0x329   : > { %v740_v62 = vmul.f32 %v3308_v34, %v738_v61  ;;  %753 = vadd.xlane.f32.xlu0 %v751_v60 }
 0x32a   : > { %v742_v19 = vmul.f32 %v3371_v18, %v3371_v18 }
 0x32b   : > { %v752_v63 = vmul.f32 %v740_v62, %v740_v62 }
 0x32d   : > { %755 = vadd.xlane.f32.xlu1 %v752_v63 }
 0x33e   : > { %724 = vperm.xlu1 %3011, %v382_v0  }
 0x33f   : > { %719 = vperm.xlu0 %3010, %v381_v1  }
 0x3b6   : > { %v754_v3 = vpop.xlane.xlu0 %753 }
 0x3b7   : > { %3016 = vrsqrt.f32 %v754_v3 }
 0x3ba   : > { %v756_v4 = vpop.xlane.xlu1 %755 }
 0x3bb   : > { %3018 = vrsqrt.f32 %v756_v4 }
 0x3be   : > { %v3353_v5 = vpop.permute.xlu1 %724  ;;  %v3355_v6 = vpop.permute.xlu0 %719 }
 0x3bf   : > { %v3358_v7 = vmul.f32 %v2661_v57, %v3353_v5  ;;  %v3361_v9 = vmul.f32 %v3355_v6, %v708_v59 }
 0x3c1   : > { %v3017_v10 = vpop.eup %3016  ;;  %842 = vmatpush1.msra.mxu0 %v3361_v9  ;;  %1083 = vmatpush1.msra.mxu1 %v3358_v7 }
 0x3c2   : > { %v759_v11 = vmul.f32 %v3017_v10, %v739_v55 }
 0x3c4   : > { %761 = vxpose.xlu1.b32.start.end [1/1] (short) %v759_v11, 128 }
 0x3c5   : > { %v3019_v12 = vpop.eup %3018 }
 0x3c6   : > { %v760_v13 = vmul.f32 %v3019_v12, %v740_v62 }
 0x3c8   : > { %1002 = vxpose.xlu0.b32.start.end [1/1] (short) %v760_v13, 128 }
 0x427   : > { %743 = vadd.xlane.f32.xlu1 %v741_v16 }
 0x431   : > { %745 = vadd.xlane.f32.xlu0 %v742_v19 }
 0x444   : > { %v777_v20 = vpop.trf.xlu1 }
 0x445   : > { %2504 = vmatmul.mubr.msk.f32.vlgmr.msra.gmra.mrb[4].mxu0 %vm391_vm0, %v777_v20 }
 0x446   : > { %911 = vmatprep.mubr.f32.mxu0 %v3147_v8 }
 0x448   : > { %v778_v21 = vpop.trf.xlu1  ;;  %v1018_v22 = vpop.trf.xlu0 }
 0x449   : > { %2505 = vmatmul.mubr.msk.f32.gmra.mrb[6].mxu0 %vm391_vm0, %v778_v21  ;;  %2521 = vmatmul.mubr.msk.f32.vlgmr.msra.gmra.mrb[4].mxu1 %vm391_vm0, %v1018_v22 }
 0x44a   : > { %917 = vmatprep.mubr.f32.mxu0 %v3147_v8  ;;  %1152 = vmatprep.mubr.f32.mxu1 %v3147_v8 }
 0x44c   : > { %v779_v23 = vpop.trf.xlu1  ;;  %v1019_v24 = vpop.trf.xlu0 }
 0x44d   : > { %2506 = vmatmul.mubr.msk.f32.gmra.mrb[8].mxu0 %vm391_vm0, %v779_v23  ;;  %2522 = vmatmul.mubr.msk.f32.gmra.mrb[6].mxu1 %vm391_vm0, %v1019_v24 }
 0x44e   : > { %923 = vmatprep.mubr.f32.mxu0 %v3147_v8  ;;  %1158 = vmatprep.mubr.f32.mxu1 %v3147_v8 }
 0x450   : > { %v780_v25 = vpop.trf.xlu1  ;;  %v1020_v26 = vpop.trf.xlu0 }
 0x451   : > { %2507 = vmatmul.mubr.msk.f32.gmra.mrb[10].mxu0 %vm391_vm0, %v780_v25  ;;  %2523 = vmatmul.mubr.msk.f32.gmra.mrb[8].mxu1 %vm391_vm0, %v1020_v26 }
 0x452   : > { %929 = vmatprep.mubr.f32.mxu0 %v3147_v8  ;;  %1164 = vmatprep.mubr.f32.mxu1 %v3147_v8 }
 0x454   : > { %v781_v27 = vpop.trf.xlu1  ;;  %v1021_v28 = vpop.trf.xlu0 }
 0x455   : > { %2508 = vmatmul.mubr.msk.f32.gmra.mrb[12].mxu0 %vm391_vm0, %v781_v27  ;;  %2524 = vmatmul.mubr.msk.f32.gmra.mrb[10].mxu1 %vm391_vm0, %v1021_v28 }
 0x456   : > { %935 = vmatprep.mubr.f32.mxu0 %v3147_v8  ;;  %1170 = vmatprep.mubr.f32.mxu1 %v3147_v8 }
 0x458   : > { %v782_v29 = vpop.trf.xlu1  ;;  %v1022_v30 = vpop.trf.xlu0 }
 0x459   : > { %2509 = vmatmul.mubr.msk.f32.gmra.mrb[14].mxu0 %vm391_vm0, %v782_v29  ;;  %2525 = vmatmul.mubr.msk.f32.gmra.mrb[12].mxu1 %vm391_vm0, %v1022_v30 }
 0x45a   : > { %941 = vmatprep.mubr.f32.mxu0 %v3147_v8  ;;  %1176 = vmatprep.mubr.f32.mxu1 %v3147_v8 }
 0x45c   : > { %v783_v32 = vpop.trf.xlu1  ;;  %v1023_v33 = vpop.trf.xlu0 }
 0x45d   : > { %2510 = vmatmul.mubr.msk.f32.gmra.mrb[16].mxu0 %vm391_vm0, %v783_v32  ;;  %2526 = vmatmul.mubr.msk.f32.gmra.mrb[14].mxu1 %vm391_vm0, %v1023_v33 }
 0x45e   : > { %947 = vmatprep.mubr.f32.mxu0 %v3147_v8  ;;  %1182 = vmatprep.mubr.f32.mxu1 %v3147_v8 }
 0x460   : > { %v784_v35 = vpop.trf.xlu1  ;;  %v1024_v36 = vpop.trf.xlu0 }
 0x461   : > { %2511 = vmatmul.mubr.msk.f32.gmra.mrb[18].mxu0 %vm391_vm0, %v784_v35  ;;  %2527 = vmatmul.mubr.msk.f32.gmra.mrb[16].mxu1 %vm391_vm0, %v1024_v36 }
 0x462   : > { %953 = vmatprep.mubr.f32.mxu0 %v3147_v8  ;;  %1188 = vmatprep.mubr.f32.mxu1 %v3147_v8 }
 0x464   : > { %v785_v37 = vpop.trf.xlu1  ;;  %v1025_v39 = vpop.trf.xlu0 }
 0x465   : > { %2512 = vmatmul.mubr.msk.f32.gmra.mrb[20].mxu0 %vm391_vm0, %v785_v37  ;;  %2528 = vmatmul.mubr.msk.f32.gmra.mrb[18].mxu1 %vm391_vm0, %v1025_v39 }
 0x466   : > { %959 = vmatprep.mubr.f32.mxu0 %v3147_v8  ;;  %1194 = vmatprep.mubr.f32.mxu1 %v3147_v8 }
 0x468   : > { %v786_v40 = vpop.trf.xlu1  ;;  %v1026_v42 = vpop.trf.xlu0 }
 0x469   : > { %2513 = vmatmul.mubr.msk.f32.gmra.mrb[22].mxu0 %vm391_vm0, %v786_v40  ;;  %2529 = vmatmul.mubr.msk.f32.gmra.mrb[20].mxu1 %vm391_vm0, %v1026_v42 }
 0x46a   : > { %965 = vmatprep.mubr.f32.mxu0 %v3147_v8  ;;  %1200 = vmatprep.mubr.f32.mxu1 %v3147_v8 }
 0x46c   : > { %v787_v43 = vpop.trf.xlu1  ;;  %v1027_v44 = vpop.trf.xlu0 }
 0x46d   : > { %2514 = vmatmul.mubr.msk.f32.gmra.mrb[24].mxu0 %vm391_vm0, %v787_v43  ;;  %2530 = vmatmul.mubr.msk.f32.gmra.mrb[22].mxu1 %vm391_vm0, %v1027_v44 }
 0x46e   : > { %971 = vmatprep.mubr.f32.mxu0 %v3147_v8  ;;  %1206 = vmatprep.mubr.f32.mxu1 %v3147_v8 }
 0x470   : > { %v788_v45 = vpop.trf.xlu1  ;;  %v1028_v46 = vpop.trf.xlu0 }
 0x471   : > { %2515 = vmatmul.mubr.msk.f32.gmra.mrb[26].mxu0 %vm391_vm0, %v788_v45  ;;  %2531 = vmatmul.mubr.msk.f32.gmra.mrb[24].mxu1 %vm391_vm0, %v1028_v46 }
 0x472   : > { %977 = vmatprep.mubr.f32.mxu0 %v3147_v8  ;;  %1212 = vmatprep.mubr.f32.mxu1 %v3147_v8 }
 0x474   : > { %v789_v47 = vpop.trf.xlu1  ;;  %v1029_v48 = vpop.trf.xlu0 }
 0x475   : > { %2516 = vmatmul.mubr.msk.f32.gmra.mrb[28].mxu0 %vm391_vm0, %v789_v47  ;;  %2532 = vmatmul.mubr.msk.f32.gmra.mrb[26].mxu1 %vm391_vm0, %v1029_v48 }
 0x476   : > { %983 = vmatprep.mubr.f32.mxu0 %v3147_v8  ;;  %1218 = vmatprep.mubr.f32.mxu1 %v3147_v8 }
 0x478   : > { %v790_v50 = vpop.trf.xlu1  ;;  %v1030_v51 = vpop.trf.xlu0 }
 0x479   : > { %2517 = vmatmul.mubr.msk.f32.gmra.mrb[30].mxu0 %vm391_vm0, %v790_v50  ;;  %2533 = vmatmul.mubr.msk.f32.gmra.mrb[28].mxu1 %vm391_vm0, %v1030_v51 }
 0x47a   : > { %989 = vmatprep.mubr.f32.mxu0 %v3147_v8  ;;  %1224 = vmatprep.mubr.f32.mxu1 %v3147_v8 }
 0x47c   : > { %v791_v41 = vpop.trf.xlu1  ;;  %v1031_v52 = vpop.trf.xlu0 }
 0x47d   : > { %2518 = vmatmul.mubr.msk.f32.gmra.mrb[32].mxu0 %vm391_vm0, %v791_v41  ;;  %2534 = vmatmul.mubr.msk.f32.gmra.mrb[30].mxu1 %vm391_vm0, %v1031_v52 }
 0x47e   : > { %995 = vmatprep.mubr.f32.mxu0 %v3147_v8  ;;  %1230 = vmatprep.mubr.f32.mxu1 %v3147_v8 }
 0x480   : > { %v792_v53 = vpop.trf.xlu1  ;;  %v1032_v54 = vpop.trf.xlu0 }
 0x481   : > { %2519 = vmatmul.mubr.msk.f32.gmra.mrb[34].mxu0 %vm391_vm0, %v792_v53  ;;  %2535 = vmatmul.mubr.msk.f32.gmra.mrb[32].mxu1 %vm391_vm0, %v1032_v54 }
 0x482   : > { %1236 = vmatprep.mubr.f32.mxu1 %v3147_v8  ;;  %1307 = vmatprep.mubr.f32.mxu0 %v3147_v8 }
 0x484   : > { %v1033_v55 = vpop.trf.xlu0 }
 0x485   : > { %2536 = vmatmul.mubr.msk.f32.gmra.mrb[34].mxu1 %vm391_vm0, %v1033_v55 }
 0x486   : > { %1378 = vmatprep.mubr.f32.mxu1 %v3147_v8 }
 0x518   : > { %v907_v56 = vpop.f32.mrb[4].mxu0 }
 0x519   : > { %v909_v57 = vpop.f32.mrb[5].mxu0 }
 0x51c   : > { %v913_v58 = vpop.f32.mrb[6].mxu0  ;;  %v1148_v59 = vpop.f32.mrb[4].mxu1 }
 0x51d   : > { %v2763_v60 = vpack.c.bf16 %v913_v58, %v907_v56  ;;  %v915_v61 = vpop.f32.mrb[7].mxu0  ;;  %v1150_v62 = vpop.f32.mrb[5].mxu1 }
 0x51e   : > { %v2761_v63 = vpack.c.bf16 %v915_v61, %v909_v57 }
 0x520   : > { %v919_v0 = vpop.f32.mrb[8].mxu0  ;;  %v1154_v1 = vpop.f32.mrb[6].mxu1  ;;  %2762 = vmatprep.subr.bf16.mxu0 %v2761_v63 }
 0x521   : > { %v2795_v3 = vpack.c.bf16 %v1154_v1, %v1148_v59  ;;  %v921_v4 = vpop.f32.mrb[9].mxu0  ;;  %v1156_v10 = vpop.f32.mrb[7].mxu1  ;;  %2764 = vmatpush1.bf16.msra.mxu0 %v2763_v60 }
 0x522   : > { %v2793_v11 = vpack.c.bf16 %v1156_v10, %v1150_v62 }
 0x524   : > { %v925_v12 = vpop.f32.mrb[10].mxu0  ;;  %v1160_v13 = vpop.f32.mrb[8].mxu1  ;;  %2794 = vmatprep.subr.bf16.mxu1 %v2793_v11 }
 0x525   : > { %v2767_v14 = vpack.c.bf16 %v925_v12, %v919_v0  ;;  %v927_v16 = vpop.f32.mrb[11].mxu0  ;;  %v1162_v17 = vpop.f32.mrb[9].mxu1  ;;  %2796 = vmatpush1.bf16.msra.mxu1 %v2795_v3 }
 0x526   : > { %v2765_v19 = vpack.c.bf16 %v927_v16, %v921_v4 }
 0x528   : > { %v931_v20 = vpop.f32.mrb[12].mxu0  ;;  %v1166_v21 = vpop.f32.mrb[10].mxu1  ;;  %2766 = vmatprep.subr.bf16.mxu0 %v2765_v19 }
 0x529   : > { %v2799_v22 = vpack.c.bf16 %v1166_v21, %v1160_v13  ;;  %v933_v23 = vpop.f32.mrb[13].mxu0  ;;  %v1168_v24 = vpop.f32.mrb[11].mxu1  ;;  %2768 = vmatpush1.bf16.msra.mxu0 %v2767_v14 }
 0x52a   : > { %v2797_v25 = vpack.c.bf16 %v1168_v24, %v1162_v17  ;;  %v744_v21 = vpop.xlane.xlu1 %743 }
 0x52b   : > { %3020 = vrsqrt.f32 %v744_v21 }
 0x52c   : > { %v937_v26 = vpop.f32.mrb[14].mxu0  ;;  %v1172_v27 = vpop.f32.mrb[12].mxu1  ;;  %2798 = vmatprep.subr.bf16.mxu1 %v2797_v25 }
 0x52d   : > { %v2771_v28 = vpack.c.bf16 %v937_v26, %v931_v20  ;;  %v939_v29 = vpop.f32.mrb[15].mxu0  ;;  %v1174_v30 = vpop.f32.mrb[13].mxu1  ;;  %2800 = vmatpush1.bf16.msra.mxu1 %v2799_v22 }
 0x52e   : > { %v2769_v32 = vpack.c.bf16 %v939_v29, %v933_v23 }
 0x530   : > { %v943_v33 = vpop.f32.mrb[16].mxu0  ;;  %v1178_v35 = vpop.f32.mrb[14].mxu1  ;;  %2770 = vmatprep.subr.bf16.mxu0 %v2769_v32 }
 0x531   : > { %v2803_v36 = vpack.c.bf16 %v1178_v35, %v1172_v27  ;;  %v945_v37 = vpop.f32.mrb[17].mxu0  ;;  %v1180_v39 = vpop.f32.mrb[15].mxu1  ;;  %2772 = vmatpush1.bf16.msra.mxu0 %v2771_v28 }
 0x532   : > { %v2801_v40 = vpack.c.bf16 %v1180_v39, %v1174_v30  ;;  %v746_v28 = vpop.xlane.xlu0 %745 }
 0x533   : > { %3022 = vrsqrt.f32 %v746_v28  ;;  %v1470_v28 = vld [vmem:[#allocation2 + $0x200] sm:$0xff] }
 0x534   : > { %v949_v42 = vpop.f32.mrb[18].mxu0  ;;  %v1184_v43 = vpop.f32.mrb[16].mxu1  ;;  %2802 = vmatprep.subr.bf16.mxu1 %v2801_v40 }
 0x535   : > { %v2775_v44 = vpack.c.bf16 %v949_v42, %v943_v33  ;;  %v951_v45 = vpop.f32.mrb[19].mxu0  ;;  %v1186_v46 = vpop.f32.mrb[17].mxu1  ;;  %2804 = vmatpush1.bf16.msra.mxu1 %v2803_v36 }
 0x536   : > { %v2773_v47 = vpack.c.bf16 %v951_v45, %v945_v37 }
 0x538   : > { %v955_v48 = vpop.f32.mrb[20].mxu0  ;;  %v1190_v50 = vpop.f32.mrb[18].mxu1  ;;  %2774 = vmatprep.subr.bf16.mxu0 %v2773_v47 }
 0x539   : > { %v2807_v51 = vpack.c.bf16 %v1190_v50, %v1184_v43  ;;  %v957_v41 = vpop.f32.mrb[21].mxu0  ;;  %v1192_v52 = vpop.f32.mrb[19].mxu1  ;;  %2776 = vmatpush1.bf16.msra.mxu0 %v2775_v44 }
 0x53a   : > { %v2805_v53 = vpack.c.bf16 %v1192_v52, %v1186_v46  ;;  %v3021_v46 = vpop.eup %3020 }
 0x53c   : > { %v961_v54 = vpop.f32.mrb[22].mxu0  ;;  %v1196_v55 = vpop.f32.mrb[20].mxu1  ;;  %2806 = vmatprep.subr.bf16.mxu1 %v2805_v53 }
 0x53d   : > { %v2779_v56 = vpack.c.bf16 %v961_v54, %v955_v48  ;;  %v963_v57 = vpop.f32.mrb[23].mxu0  ;;  %v1198_v58 = vpop.f32.mrb[21].mxu1  ;;  %2808 = vmatpush1.bf16.msra.mxu1 %v2807_v51  ;;  %v749_v51 = vmul.f32 %v3021_v46, %v3366_v15  ;;  %v1385_v54 = vmul.f32 8.0, %v3361_v9 }
 0x53e   : > { %v2777_v59 = vpack.c.bf16 %v963_v57, %v957_v41  ;;  %v3023_v52 = vpop.eup %3022 }
 0x53f   : > { %v750_v53 = vmul.f32 %v3023_v52, %v3371_v18  ;;  %v1468_v52 = vld [vmem:[#allocation2 + $0x1f0] sm:$0xff] }
 0x540   : > { %v967_v60 = vpop.f32.mrb[24].mxu0  ;;  %v1202_v61 = vpop.f32.mrb[22].mxu1  ;;  %2778 = vmatprep.subr.bf16.mxu0 %v2777_v59  ;;  %v1386_v59 = vmul.f32 8.0, %v3358_v7 }
 0x541   : > { %v2811_v62 = vpack.c.bf16 %v1202_v61, %v1196_v55  ;;  %v969_v63 = vpop.f32.mrb[25].mxu0  ;;  %v1204_v0 = vpop.f32.mrb[23].mxu1  ;;  %2780 = vmatpush1.bf16.msra.mxu0 %v2779_v56 }
 0x542   : > { %v2809_v1 = vpack.c.bf16 %v1204_v0, %v1198_v58 }
 0x544   : > { %v973_v3 = vpop.f32.mrb[26].mxu0  ;;  %v1208_v4 = vpop.f32.mrb[24].mxu1  ;;  %2810 = vmatprep.subr.bf16.mxu1 %v2809_v1 }
 0x545   : > { %v2783_v10 = vpack.c.bf16 %v973_v3, %v967_v60  ;;  %v975_v11 = vpop.f32.mrb[27].mxu0  ;;  %v1210_v12 = vpop.f32.mrb[25].mxu1  ;;  %2812 = vmatpush1.bf16.msra.mxu1 %v2811_v62 }
 0x546   : > { %v2781_v13 = vpack.c.bf16 %v975_v11, %v969_v63 }
 0x548   : > { %v979_v14 = vpop.f32.mrb[28].mxu0  ;;  %v1214_v16 = vpop.f32.mrb[26].mxu1  ;;  %2782 = vmatprep.subr.bf16.mxu0 %v2781_v13  ;;  %v1458_v13 = vld [vmem:[#allocation2 + $0x1a0] sm:$0xff] }
 0x549   : > { %v2815_v17 = vpack.c.bf16 %v1214_v16, %v1208_v4  ;;  %v981_v19 = vpop.f32.mrb[29].mxu0  ;;  %v1216_v20 = vpop.f32.mrb[27].mxu1  ;;  %2784 = vmatpush1.bf16.msra.mxu0 %v2783_v10 }
 0x54a   : > { %v2813_v22 = vpack.c.bf16 %v1216_v20, %v1210_v12  ;;  %v1455_v12 = vld [vmem:[#allocation2 + $0x188] sm:$0xff]  ;;  %v1464_v20 = vld [vmem:[#allocation2 + $0x1d0] sm:$0xff] }
 0x54b   : > { %v2825_v16 = vpack.c.bf16 %v1458_v13, %v1455_v12  ;;  %v1487_v12 = vld [vmem:[#allocation2 + $0x288] sm:$0xff] }
 0x54c   : > { %v985_v23 = vpop.f32.mrb[30].mxu0  ;;  %v1220_v24 = vpop.f32.mrb[28].mxu1  ;;  %2814 = vmatprep.subr.bf16.mxu1 %v2813_v22 }
 0x54d   : > { %v2787_v25 = vpack.c.bf16 %v985_v23, %v979_v14  ;;  %v987_v26 = vpop.f32.mrb[31].mxu0  ;;  %v1222_v27 = vpop.f32.mrb[29].mxu1  ;;  %2816 = vmatpush1.bf16.msra.mxu1 %v2815_v17  ;;  %v1454_v14 = vld [vmem:[#allocation2 + $0x180] sm:$0xff]  ;;  %v1457_v17 = vld [vmem:[#allocation2 + $0x198] sm:$0xff]  ;;  %v1456_v23 = vld [vmem:[#allocation2 + $0x190] sm:$0xff] }
 0x54e   : > { %v2785_v29 = vpack.c.bf16 %v987_v26, %v981_v19  ;;  %v1461_v19 = vld [vmem:[#allocation2 + $0x1b8] sm:$0xff]  ;;  %v2827_v21 = vpack.c.bf16 %v1457_v17, %v1454_v14  ;;  %v1463_v26 = vld [vmem:[#allocation2 + $0x1c8] sm:$0xff]  ;;  %v1494_v17 = vld [vmem:[#allocation2 + $0x2c0] sm:$0xff] }
 0x54f   : > { %v2829_v22 = vpack.c.bf16 %v1464_v20, %v1461_v19  ;;  %v1486_v19 = vld [vmem:[#allocation2 + $0x280] sm:$0xff] }
 0x550   : > { %v991_v30 = vpop.f32.mrb[32].mxu0  ;;  %v1226_v32 = vpop.f32.mrb[30].mxu1  ;;  %2786 = vmatprep.subr.bf16.mxu0 %v2785_v29  ;;  %v1462_v29 = vld [vmem:[#allocation2 + $0x1c0] sm:$0xff] }
 0x551   : > { %v2819_v33 = vpack.c.bf16 %v1226_v32, %v1220_v24  ;;  %v993_v35 = vpop.f32.mrb[33].mxu0  ;;  %v1228_v36 = vpop.f32.mrb[31].mxu1  ;;  %2788 = vmatpush1.bf16.msra.mxu0 %v2787_v25  ;;  %v1459_v24 = vld [vmem:[#allocation2 + $0x1a8] sm:$0xff] }
 0x552   : > { %v2817_v37 = vpack.c.bf16 %v1228_v36, %v1222_v27  ;;  %v2857_v25 = vpack.c.bf16 %v1459_v24, %v1456_v23  ;;  %v1467_v27 = vld [vmem:[#allocation2 + $0x1e8] sm:$0xff]  ;;  %v1493_v23 = vld [vmem:[#allocation2 + $0x2b8] sm:$0xff] }
 0x553   : > { %v2833_v32 = vpack.c.bf16 %v1470_v28, %v1467_v27  ;;  %v1492_v27 = vld [vmem:[#allocation2 + $0x2b0] sm:$0xff] }
 0x554   : > { %v997_v39 = vpop.f32.mrb[34].mxu0  ;;  %v1232_v40 = vpop.f32.mrb[32].mxu1  ;;  %2818 = vmatprep.subr.bf16.mxu1 %v2817_v37 }
 0x555   : > { %v2791_v42 = vpack.c.bf16 %v997_v39, %v991_v30  ;;  %v999_v43 = vpop.f32.mrb[35].mxu0  ;;  %v1234_v44 = vpop.f32.mrb[33].mxu1  ;;  %2820 = vmatpush1.bf16.msra.mxu1 %v2819_v33  ;;  %v1465_v30 = vld [vmem:[#allocation2 + $0x1d8] sm:$0xff] }
 0x556   : > { %v2789_v45 = vpack.c.bf16 %v999_v43, %v993_v35  ;;  %v2861_v33 = vpack.c.bf16 %v1465_v30, %v1462_v29  ;;  %v1496_v29 = vld [vmem:[#allocation2 + $0x2d0] sm:$0xff]  ;;  %v1499_v30 = vld [vmem:[#allocation2 + $0x2e8] sm:$0xff] }
 0x558   : > { %v1238_v47 = vpop.f32.mrb[34].mxu1  ;;  %2790 = vmatprep.subr.bf16.mxu0 %v2789_v45 }
 0x559   : > { %v2823_v48 = vpack.c.bf16 %v1238_v47, %v1232_v40  ;;  %v1240_v50 = vpop.f32.mrb[35].mxu1  ;;  %2792 = vmatpush1.bf16.msra.mxu0 %v2791_v42  ;;  %v1466_v47 = vld [vmem:[#allocation2 + $0x1e0] sm:$0xff] }
 0x55a   : > { %v2821_v41 = vpack.c.bf16 %v1240_v50, %v1234_v44  ;;  %2826 = vmatprep.subr.bf16.mxu0 %v2825_v16  ;;  %v1491_v16 = vld [vmem:[#allocation2 + $0x2a8] sm:$0xff] }
 0x55b   : > { %v2849_v20 = vpack.c.bf16 %v1494_v17, %v1491_v16 }
 0x55c   : > { %1308 = vmatmul.mubr.f32.vlgmr.msra.gmra.mrb[36].mxu0 %v749_v51  ;;  %2822 = vmatprep.subr.bf16.mxu1 %v2821_v41  ;;  %v1473_v51 = vld [vmem:[#allocation2 + $0x218] sm:$0xff]  ;;  %v1476_v41 = vld [vmem:[#allocation2 + $0x230] sm:$0xff] }
 0x55d   : > { %2824 = vmatpush1.bf16.msra.mxu1 %v2823_v48  ;;  %1566 = vmatprep.mubr.f32.mxu0 %v3147_v8  ;;  %v1469_v48 = vld [vmem:[#allocation2 + $0x1f8] sm:$0xff] }
 0x55e   : > { %2828 = vmatpush1.bf16.msra.mxu0 %v2827_v21  ;;  %2858 = vmatprep.subr.bf16.mxu1 %v2857_v25  ;;  %v2835_v50 = vpack.c.bf16 %v1469_v48, %v1466_v47  ;;  %v1489_v21 = vld [vmem:[#allocation2 + $0x298] sm:$0xff] }
 0x55f   : > { %2830 = vmatprep.subr.bf16.mxu0 %v2829_v22  ;;  %v1490_v22 = vld [vmem:[#allocation2 + $0x2a0] sm:$0xff]  ;;  %v2877_v24 = vpack.c.bf16 %v1489_v21, %v1486_v19 }
 0x560   : > { %1379 = vmatmul.mubr.f32.vlgmr.msra.gmra.mrb[36].mxu1 %v750_v53  ;;  %v2837_v53 = vpack.c.bf16 %v1476_v41, %v1473_v51 }
 0x561   : > { %2860 = vmatpush3.bf16.msra.mxu1 %v2857_v25  ;;  %v1497_v25 = vld [vmem:[#allocation2 + $0x2d8] sm:$0xff] }
 0x562   : > { %2862 = vmatprep.subr.bf16.mxu1 %v2861_v33 }
 0x565   : > { %2864 = vmatpush3.bf16.msra.mxu1 %v2861_v33  ;;  %v2855_v33 = vpack.c.bf16 %v1499_v30, %v1496_v29 }
 0x62f   : > { %v1309_v55 = vpop.f32.mrb[36].mxu0 }
 0x630   : > { %v1387_v56 = vadd.f32 %v1385_v54, %v1309_v55  ;;  %v1311_v57 = vpop.f32.mrb[37].mxu0  ;;  %v1471_v54 = vld [vmem:[#allocation2 + $0x208] sm:$0xff]  ;;  %v1472_v55 = vld [vmem:[#allocation2 + $0x210] sm:$0xff] }
 0x631   : > { %v1389_v58 = vadd.f32 8.0, %v1311_v57  ;;  %v2865_v57 = vpack.c.bf16 %v1471_v54, %v1468_v52 }
 0x633   : > { %3024 = vrcp.f32 %v1389_v58  ;;  %v1380_v15 = vpop.f32.mrb[36].mxu1  ;;  %2866 = vmatprep.subr.bf16.mxu1 %v2865_v57 }
 0x634   : > { %v1388_v60 = vadd.f32 %v1386_v59, %v1380_v15  ;;  %v1382_v61 = vpop.f32.mrb[37].mxu1  ;;  %v1479_v59 = vld [vmem:[#allocation2 + $0x248] sm:$0xff]  ;;  %v1482_v15 = vld [vmem:[#allocation2 + $0x260] sm:$0xff]  ;;  %2868 = vmatpush3.bf16.msra.mxu1 %v2865_v57 }
 0x635   : > { %v1390_v62 = vadd.f32 8.0, %v1382_v61  ;;  %v2841_v61 = vpack.c.bf16 %v1482_v15, %v1479_v59 }
 0x637   : > { %3026 = vrcp.f32 %v1390_v62  ;;  %v1477_v62 = vld [vmem:[#allocation2 + $0x238] sm:$0xff] }
 0x63d   : > { %v3025_v63 = vpop.eup %3024 }
 0x63e   : > { %1395 = vperm.xlu1 %3011, %v3025_v63   ;;  %v1478_v63 = vld [vmem:[#allocation2 + $0x240] sm:$0xff] }
 0x641   : > { %v3027_v0 = vpop.eup %3026 }
 0x642   : > { %1400 = vperm.xlu1 %3011, %v3027_v0   ;;  %v1481_v0 = vld [vmem:[#allocation2 + $0x258] sm:$0xff] }
 0x6bd   : > { %v1396_v18 = vpop.permute.xlu1 %1395 }
 0x6be   : > { %v1403_v1 = vmul.f32 %v1396_v18, %v1387_v56  ;;  %v1475_v56 = vld [vmem:[#allocation2 + $0x228] sm:$0xff] }
 0x6bf   : > { %v2839_v58 = vpack.c.bf16 %v1475_v56, %v1472_v55 }
 0x6c0   : > { %v1405_v9 = vadd.f32 %v1403_v1, %v3328_v49  ;;  %v1460_v49 = vld [vmem:[#allocation2 + $0x1b0] sm:$0xff]  ;;  %v2843_v1 = vpack.c.bf16 %v1481_v0, %v1478_v63 }
 0x6c1   : > { %v1401_v3 = vpop.permute.xlu1 %1400 }
 0x6c2   : > { %v1404_v4 = vmul.f32 %v1401_v3, %v1388_v60  ;;  %v1407_v10 = vmul.f32 0.5, %v1405_v9  ;;  %v1474_v60 = vld [vmem:[#allocation2 + $0x220] sm:$0xff]  ;;  %v1485_v9 = vld [vmem:[#allocation2 + $0x278] sm:$0xff]  ;;  %v1488_v3 = vld [vmem:[#allocation2 + $0x290] sm:$0xff] }
 0x6c3   : > { %v2869_v18 = vpack.c.bf16 %v1477_v62, %v1474_v60 }
 0x6c4   : > { %1411 = vadd.xlane.f32.xlu1 %v1407_v10  ;;  %v1406_v7 = vadd.f32 %v1404_v4, %v3333_v38  ;;  %v2831_v38 = vpack.c.bf16 %v1463_v26, %v1460_v49  ;;  %v1480_v4 = vld [vmem:[#allocation2 + $0x250] sm:$0xff]  ;;  %v2851_v49 = vpack.c.bf16 %v1493_v23, %v1490_v22 }
 0x6c5   : > { %2870 = vmatprep.subr.bf16.mxu1 %v2869_v18  ;;  %v1500_v26 = vld [vmem:[#allocation2 + $0x2f0] sm:$0xff] }
 0x6c6   : > { %v1408_v11 = vmul.f32 0.5, %v1406_v7  ;;  %2832 = vmatpush1.bf16.msra.mxu0 %v2831_v38  ;;  %2872 = vmatpush3.bf16.msra.mxu1 %v2869_v18  ;;  %v1483_v7 = vld [vmem:[#allocation2 + $0x268] sm:$0xff]  ;;  %v2853_v28 = vpack.c.bf16 %v1500_v26, %v1497_v25 }
 0x6c7   : > { %2834 = vmatprep.subr.bf16.mxu0 %v2833_v32  ;;  %v2873_v13 = vpack.c.bf16 %v1483_v7, %v1480_v4  ;;  %v1495_v38 = vld [vmem:[#allocation2 + $0x2c8] sm:$0xff] }
 0x6c8   : > { %1413 = vadd.xlane.f32.xlu0 %v1408_v11  ;;  %v2881_v32 = vpack.c.bf16 %v1495_v38, %v1492_v27 }
 0x6c9   : > { %2874 = vmatprep.subr.bf16.mxu1 %v2873_v13 }
 0x6ca   : > { %2836 = vmatpush1.bf16.msra.mxu0 %v2835_v50  ;;  %2876 = vmatpush3.bf16.msra.mxu1 %v2873_v13  ;;  %v2537_v50 = vld [vmem:[%s3636_s7] ss:$0 sm:$0xff] }
 0x6cb   : > { %2838 = vmatprep.subr.bf16.mxu0 %v2837_v53  ;;  %2878 = vmatprep.subr.bf16.mxu1 %v2877_v24 }
 0x6ce   : > { %2840 = vmatpush1.bf16.msra.mxu0 %v2839_v58  ;;  %2880 = vmatpush3.bf16.msra.mxu1 %v2877_v24 }
 0x6cf   : > { %2842 = vmatprep.subr.bf16.mxu0 %v2841_v61  ;;  %2882 = vmatprep.subr.bf16.mxu1 %v2881_v32 }
 0x6d2   : > { %2844 = vmatpush1.bf16.msra.mxu0 %v2843_v1  ;;  %2884 = vmatpush3.bf16.msra.mxu1 %v2881_v32 }
 0x751   : > { %v1412_v35 = vpop.xlane.xlu1 %1411 }
 0x752   : > { %v1415_v36 = vmul.f32 0.03125, %v1412_v35  ;;  %v1498_v35 = vld [vmem:[#allocation2 + $0x2e0] sm:$0xff] }
 0x754   : > { %v1417_v37 = vsub.f32 %v1407_v10, %v1415_v36  ;;  %v2845_v10 = vpack.c.bf16 %v1488_v3, %v1485_v9  ;;  %v1501_v36 = vld [vmem:[#allocation2 + $0x2f8] sm:$0xff] }
 0x755   : > { %v1414_v39 = vpop.xlane.xlu0 %1413 }
 0x756   : > { %v1416_v40 = vmul.f32 0.03125, %v1414_v39  ;;  %v3447_v42 = vmul.f32 %v3308_v34, %v1417_v37  ;;  %2846 = vmatprep.subr.bf16.mxu0 %v2845_v10  ;;  %v2885_v37 = vpack.c.bf16 %v1501_v36, %v1498_v35 }
 0x758   : > { %v1418_v43 = vsub.f32 %v1408_v11, %v1416_v40  ;;  %v1421_v44 = vmul.f32 %v3447_v42, %v3447_v42  ;;  %v1484_v11 = vld [vmem:[#allocation2 + $0x270] sm:$0xff]  ;;  %2886 = vmatprep.subr.bf16.mxu1 %v2885_v37 }
 0x759   : > { %v2847_v14 = vpack.c.bf16 %v1487_v12, %v1484_v11  ;;  %2888 = vmatpush3.bf16.msra.mxu1 %v2885_v37 }
 0x75a   : > { %1423 = vadd.xlane.f32.xlu0 %v1421_v44  ;;  %v3452_v45 = vmul.f32 %v3308_v34, %v1418_v43  ;;  %2539 = vmatprep.subr.msk.mxu1 %vm376_vm4, %v3149_v2 }
 0x75b   : > { %2848 = vmatpush1.bf16.msra.mxu0 %v2847_v14 }
 0x75c   : > { %v1422_v46 = vmul.f32 %v3452_v45, %v3452_v45  ;;  %2850 = vmatprep.subr.bf16.mxu0 %v2849_v20 }
 0x75e   : > { %1425 = vadd.xlane.f32.xlu0 %v1422_v46 }
 0x75f   : > { %2852 = vmatpush1.bf16.msra.mxu0 %v2851_v49 }
 0x760   : > { %2854 = vmatprep.subr.bf16.mxu0 %v2853_v28 }
 0x763   : > { %2856 = vmatpush1.bf16.msra.mxu0 %v2855_v33 }
 0x764   : > { %2556 = vmatprep.subr.msk.mxu0 %vm376_vm4, %v3149_v2 }
 0x7e7   : > { %v1424_v39 = vpop.xlane.xlu0 %1423 }
 0x7e8   : > { %v1427_v40 = vmul.f32 0.03125, %v1424_v39 }
 0x7ea   : > { %v1429_v43 = vadd.f32 1e-05, %v1427_v40 }
 0x7eb   : > { %v1426_v44 = vpop.xlane.xlu0 %1425 }
 0x7ec   : > { %3028 = vrsqrt.f32 %v1429_v43  ;;  %v1428_v46 = vmul.f32 0.03125, %v1426_v44 }
 0x7ee   : > { %v1430_v47 = vadd.f32 1e-05, %v1428_v46 }
 0x7f0   : > { %3030 = vrsqrt.f32 %v1430_v47 }
 0x7f6   : > { %v3029_v48 = vpop.eup %3028 }
 0x7f7   : > { %v1433_v51 = vmul.f32 %v3029_v48, %v3447_v42 }
 0x7f9   : > { %v1441_v2 = vmul.f32 %v2537_v50, %v1433_v51 }
 0x7fa   : > { %v3031_v41 = vpop.eup %3030 }
 0x7fb   : > { %v1449_v52 = vadd.f32 %v2538_v31, %v1441_v2  ;;  %v1434_v53 = vmul.f32 %v3031_v41, %v3452_v45 }
 0x7fd   : > { %v3470_v54 = vmax.f32 %v1449_v52, 0.0  ;;  %v1442_v55 = vmul.f32 %v2537_v50, %v1434_v53 }
 0x7ff   : > { %1567 = vmatmul.mubr.f32.vlgmr.msra.gmra.mrb[38].mxu0 %v3470_v54  ;;  %2694 = vmatprep.mubr.f32.mxu1 %v3470_v54  ;;  %v1450_v56 = vadd.f32 %v2538_v31, %v1442_v55 }
 0x800   : > { %1572 = vmatprep.mubr.f32.mxu0 %v3147_v8 }
 0x801   : > { %v3475_v42 = vmax.f32 %v1450_v56, 0.0 }
 0x803   : > { %1573 = vmatmul.mubr.f32.gmra.mrb[40].mxu0 %v3475_v42  ;;  %2695 = vmatmul.mubr.f32.vlgmr.msra.gmra.mrb[38].mxu1 %v3475_v42 }
 0x804   : > { %1832 = vmatprep.mubr.f32.mxu1 %v3147_v8  ;;  %2073 = vmatprep.mubr.f32.mxu0 %v3147_v8 }
 0x8d2   : > { %v1568_v45 = vpop.f32.mrb[38].mxu0 }
 0x8d3   : > { %v1570_v57 = vpop.f32.mrb[39].mxu0  ;;  %vm1656_vm10 = vcmp.eq.f32.partialorder %v1568_v45, 0.0 }
 0x8d4   : > { %vm1662_vm7 = vcmp.eq.f32.partialorder %v1570_v57, 0.0  ;;  %v1658_v13 = vsel %vm1656_vm10, 1e-06, %v1568_v45 }
 0x8d5   : > { %v1664_v58 = vsel %vm1662_vm7, 1e-06, %v1570_v57  ;;  %v3495_v16 = vmul.f32 %v3308_v34, %v1658_v13 }
 0x8d6   : > { %v1666_v59 = vmul.f32 %v3308_v34, %v1664_v58  ;;  %v1574_v15 = vpop.f32.mrb[40].mxu0  ;;  %v2696_v60 = vpop.f32.mrb[38].mxu1 }
 0x8d7   : > { %v3483_v61 = vmul.f32 %v2696_v60, %v3353_v5  ;;  %v1576_v62 = vpop.f32.mrb[41].mxu0  ;;  %v1645_v63 = vpop.f32.mrb[39].mxu1  ;;  %vm1657_vm9 = vcmp.eq.f32.partialorder %v1574_v15, 0.0  ;;  %v1668_v19 = vmul.f32 %v3495_v16, %v3495_v16 }
 0x8d8   : > { %vm1663_vm8 = vcmp.eq.f32.partialorder %v1576_v62, 0.0  ;;  %v3486_v0 = vmul.f32 %v1645_v63, %v3355_v6  ;;  %v1678_v18 = vmul.f32 %v1666_v59, %v1666_v59  ;;  %v1659_v12 = vsel %vm1657_vm9, 1e-06, %v1574_v15 }
 0x8d9   : > { %v1665_v1 = vsel %vm1663_vm8, 1e-06, %v1576_v62  ;;  %2010 = vmatpush1.msra.mxu0 %v3483_v61  ;;  %v3492_v14 = vmul.f32 %v3308_v34, %v1659_v12 }
 0x8da   : > { %v1667_v9 = vmul.f32 %v3308_v34, %v1665_v1  ;;  %1680 = vadd.xlane.f32.xlu0 %v1678_v18  ;;  %1769 = vmatpush1.msra.mxu1 %v3486_v0 }
 0x8db   : > { %v1669_v17 = vmul.f32 %v3492_v14, %v3492_v14 }
 0x8dc   : > { %v1679_v3 = vmul.f32 %v1667_v9, %v1667_v9 }
 0x8de   : > { %1682 = vadd.xlane.f32.xlu0 %v1679_v3 }
 0x967   : > { %v1681_v4 = vpop.xlane.xlu0 %1680 }
 0x968   : > { %3032 = vrsqrt.f32 %v1681_v4 }
 0x96b   : > { %v1683_v5 = vpop.xlane.xlu0 %1682 }
 0x96c   : > { %3034 = vrsqrt.f32 %v1683_v5 }
 0x972   : > { %v3033_v10 = vpop.eup %3032 }
 0x973   : > { %v1686_v7 = vmul.f32 %v3033_v10, %v1666_v59 }
 0x975   : > { %1688 = vxpose.xlu0.b32.start.end [1/1] (short) %v1686_v7, 128 }
 0x976   : > { %v3035_v6 = vpop.eup %3034 }
 0x977   : > { %v1687_v11 = vmul.f32 %v3035_v6, %v1667_v9 }
 0x979   : > { %1929 = vxpose.xlu1.b32.start.end [1/1] (short) %v1687_v11, 128 }
 0x9dc   : > { %1672 = vadd.xlane.f32.xlu1 %v1669_v17 }
 0x9de   : > { %1670 = vadd.xlane.f32.xlu0 %v1668_v19 }
 0x9f5   : > { %v1704_v20 = vpop.trf.xlu0 }
 0x9f6   : > { %2540 = vmatmul.mubr.msk.f32.vlgmr.msra.gmra.mrb[40].mxu1 %vm391_vm0, %v1704_v20 }
 0x9f7   : > { %1838 = vmatprep.mubr.f32.mxu1 %v3147_v8 }
 0x9f9   : > { %v1945_v21 = vpop.trf.xlu1  ;;  %v1705_v22 = vpop.trf.xlu0 }
 0x9fa   : > { %2541 = vmatmul.mubr.msk.f32.gmra.mrb[42].mxu1 %vm391_vm0, %v1705_v22  ;;  %2557 = vmatmul.mubr.msk.f32.vlgmr.msra.gmra.mrb[42].mxu0 %vm391_vm0, %v1945_v21 }
 0x9fb   : > { %2079 = vmatprep.mubr.f32.mxu0 %v3147_v8  ;;  %1844 = vmatprep.mubr.f32.mxu1 %v3147_v8 }
 0x9fd   : > { %v1946_v23 = vpop.trf.xlu1  ;;  %v1706_v24 = vpop.trf.xlu0 }
 0x9fe   : > { %2542 = vmatmul.mubr.msk.f32.gmra.mrb[44].mxu1 %vm391_vm0, %v1706_v24  ;;  %2558 = vmatmul.mubr.msk.f32.gmra.mrb[44].mxu0 %vm391_vm0, %v1946_v23 }
 0x9ff   : > { %2085 = vmatprep.mubr.f32.mxu0 %v3147_v8  ;;  %1850 = vmatprep.mubr.f32.mxu1 %v3147_v8 }
 0xa01   : > { %v1947_v49 = vpop.trf.xlu1  ;;  %v1707_v25 = vpop.trf.xlu0 }
 0xa02   : > { %2543 = vmatmul.mubr.msk.f32.gmra.mrb[46].mxu1 %vm391_vm0, %v1707_v25  ;;  %2559 = vmatmul.mubr.msk.f32.gmra.mrb[46].mxu0 %vm391_vm0, %v1947_v49 }
 0xa03   : > { %2091 = vmatprep.mubr.f32.mxu0 %v3147_v8  ;;  %1856 = vmatprep.mubr.f32.mxu1 %v3147_v8 }
 0xa05   : > { %v1948_v26 = vpop.trf.xlu1  ;;  %v1708_v27 = vpop.trf.xlu0 }
 0xa06   : > { %2544 = vmatmul.mubr.msk.f32.gmra.mrb[48].mxu1 %vm391_vm0, %v1708_v27  ;;  %2560 = vmatmul.mubr.msk.f32.gmra.mrb[48].mxu0 %vm391_vm0, %v1948_v26 }
 0xa07   : > { %2097 = vmatprep.mubr.f32.mxu0 %v3147_v8  ;;  %1862 = vmatprep.mubr.f32.mxu1 %v3147_v8 }
 0xa09   : > { %v1949_v28 = vpop.trf.xlu1  ;;  %v1709_v38 = vpop.trf.xlu0 }
 0xa0a   : > { %2545 = vmatmul.mubr.msk.f32.gmra.mrb[50].mxu1 %vm391_vm0, %v1709_v38  ;;  %2561 = vmatmul.mubr.msk.f32.gmra.mrb[50].mxu0 %vm391_vm0, %v1949_v28 }
 0xa0b   : > { %2103 = vmatprep.mubr.f32.mxu0 %v3147_v8  ;;  %1868 = vmatprep.mubr.f32.mxu1 %v3147_v8 }
 0xa0d   : > { %v1950_v29 = vpop.trf.xlu1  ;;  %v1710_v30 = vpop.trf.xlu0 }
 0xa0e   : > { %2546 = vmatmul.mubr.msk.f32.gmra.mrb[52].mxu1 %vm391_vm0, %v1710_v30  ;;  %2562 = vmatmul.mubr.msk.f32.gmra.mrb[52].mxu0 %vm391_vm0, %v1950_v29 }
 0xa0f   : > { %2109 = vmatprep.mubr.f32.mxu0 %v3147_v8  ;;  %1874 = vmatprep.mubr.f32.mxu1 %v3147_v8 }
 0xa11   : > { %v1951_v32 = vpop.trf.xlu1  ;;  %v1711_v33 = vpop.trf.xlu0 }
 0xa12   : > { %2547 = vmatmul.mubr.msk.f32.gmra.mrb[54].mxu1 %vm391_vm0, %v1711_v33  ;;  %2563 = vmatmul.mubr.msk.f32.gmra.mrb[54].mxu0 %vm391_vm0, %v1951_v32 }
 0xa13   : > { %2115 = vmatprep.mubr.f32.mxu0 %v3147_v8  ;;  %1880 = vmatprep.mubr.f32.mxu1 %v3147_v8 }
 0xa15   : > { %v1952_v35 = vpop.trf.xlu1  ;;  %v1712_v36 = vpop.trf.xlu0 }
 0xa16   : > { %2548 = vmatmul.mubr.msk.f32.gmra.mrb[56].mxu1 %vm391_vm0, %v1712_v36  ;;  %2564 = vmatmul.mubr.msk.f32.gmra.mrb[56].mxu0 %vm391_vm0, %v1952_v35 }
 0xa17   : > { %2121 = vmatprep.mubr.f32.mxu0 %v3147_v8  ;;  %1886 = vmatprep.mubr.f32.mxu1 %v3147_v8 }
 0xa19   : > { %v1953_v37 = vpop.trf.xlu1  ;;  %v1713_v39 = vpop.trf.xlu0 }
 0xa1a   : > { %2549 = vmatmul.mubr.msk.f32.gmra.mrb[58].mxu1 %vm391_vm0, %v1713_v39  ;;  %2565 = vmatmul.mubr.msk.f32.gmra.mrb[58].mxu0 %vm391_vm0, %v1953_v37 }
 0xa1b   : > { %2127 = vmatprep.mubr.f32.mxu0 %v3147_v8  ;;  %1892 = vmatprep.mubr.f32.mxu1 %v3147_v8 }
 0xa1d   : > { %v1954_v40 = vpop.trf.xlu1  ;;  %v1714_v43 = vpop.trf.xlu0 }
 0xa1e   : > { %2550 = vmatmul.mubr.msk.f32.gmra.mrb[60].mxu1 %vm391_vm0, %v1714_v43  ;;  %2566 = vmatmul.mubr.msk.f32.gmra.mrb[60].mxu0 %vm391_vm0, %v1954_v40 }
 0xa1f   : > { %2133 = vmatprep.mubr.f32.mxu0 %v3147_v8  ;;  %1898 = vmatprep.mubr.f32.mxu1 %v3147_v8 }
 0xa21   : > { %v1955_v44 = vpop.trf.xlu1  ;;  %v1715_v46 = vpop.trf.xlu0 }
 0xa22   : > { %2551 = vmatmul.mubr.msk.f32.gmra.mrb[62].mxu1 %vm391_vm0, %v1715_v46  ;;  %2567 = vmatmul.mubr.msk.f32.gmra.mrb[62].mxu0 %vm391_vm0, %v1955_v44 }
 0xa23   : > { %2139 = vmatprep.mubr.f32.mxu0 %v3147_v8  ;;  %1904 = vmatprep.mubr.f32.mxu1 %v3147_v8 }
 0xa25   : > { %v1956_v47 = vpop.trf.xlu1  ;;  %v1716_v48 = vpop.trf.xlu0 }
 0xa26   : > { %2552 = vmatmul.mubr.msk.f32.gmra.mrb[64].mxu1 %vm391_vm0, %v1716_v48  ;;  %2568 = vmatmul.mubr.msk.f32.gmra.mrb[64].mxu0 %vm391_vm0, %v1956_v47 }
 0xa27   : > { %2145 = vmatprep.mubr.f32.mxu0 %v3147_v8  ;;  %1910 = vmatprep.mubr.f32.mxu1 %v3147_v8 }
 0xa29   : > { %v1957_v50 = vpop.trf.xlu1  ;;  %v1717_v51 = vpop.trf.xlu0 }
 0xa2a   : > { %2553 = vmatmul.mubr.msk.f32.gmra.mrb[66].mxu1 %vm391_vm0, %v1717_v51  ;;  %2569 = vmatmul.mubr.msk.f32.gmra.mrb[66].mxu0 %vm391_vm0, %v1957_v50 }
 0xa2b   : > { %2151 = vmatprep.mubr.f32.mxu0 %v3147_v8  ;;  %1916 = vmatprep.mubr.f32.mxu1 %v3147_v8 }
 0xa2d   : > { %v1958_v31 = vpop.trf.xlu1  ;;  %v1718_v2 = vpop.trf.xlu0 }
 0xa2e   : > { %2554 = vmatmul.mubr.msk.f32.gmra.mrb[68].mxu1 %vm391_vm0, %v1718_v2  ;;  %2570 = vmatmul.mubr.msk.f32.gmra.mrb[68].mxu0 %vm391_vm0, %v1958_v31 }
 0xa2f   : > { %2157 = vmatprep.mubr.f32.mxu0 %v3147_v8  ;;  %1922 = vmatprep.mubr.f32.mxu1 %v3147_v8 }
 0xa31   : > { %v1959_v41 = vpop.trf.xlu1  ;;  %v1719_v52 = vpop.trf.xlu0 }
 0xa32   : > { %2555 = vmatmul.mubr.msk.f32.gmra.mrb[70].mxu1 %vm391_vm0, %v1719_v52  ;;  %2571 = vmatmul.mubr.msk.f32.gmra.mrb[70].mxu0 %vm391_vm0, %v1959_v41 }
 0xa33   : > { %2163 = vmatprep.mubr.f32.mxu0 %v3147_v8  ;;  %2234 = vmatprep.mubr.f32.mxu1 %v3147_v8 }
 0xa35   : > { %v1960_v53 = vpop.trf.xlu1 }
 0xa36   : > { %2572 = vmatmul.mubr.msk.f32.gmra.mrb[72].mxu0 %vm391_vm0, %v1960_v53 }
 0xa37   : > { %2305 = vmatprep.mubr.f32.mxu0 %v3147_v8 }
 0xac9   : > { %v1834_v55 = vpop.f32.mrb[40].mxu1 }
 0xaca   : > { %v1836_v56 = vpop.f32.mrb[41].mxu1 }
 0xacd   : > { %v1840_v45 = vpop.f32.mrb[42].mxu1  ;;  %v2075_v57 = vpop.f32.mrb[42].mxu0 }
 0xace   : > { %v2891_v58 = vpack.c.bf16 %v1840_v45, %v1834_v55  ;;  %v1842_v59 = vpop.f32.mrb[43].mxu1  ;;  %v2077_v15 = vpop.f32.mrb[43].mxu0 }
 0xacf   : > { %v2889_v60 = vpack.c.bf16 %v1842_v59, %v1836_v56 }
 0xad1   : > { %v1846_v62 = vpop.f32.mrb[44].mxu1  ;;  %v2081_v63 = vpop.f32.mrb[44].mxu0  ;;  %2890 = vmatprep.subr.bf16.mxu1 %v2889_v60 }
 0xad2   : > { %v2923_v18 = vpack.c.bf16 %v2081_v63, %v2075_v57  ;;  %v1848_v1 = vpop.f32.mrb[45].mxu1  ;;  %v2083_v9 = vpop.f32.mrb[45].mxu0  ;;  %2892 = vmatpush1.bf16.msra.mxu1 %v2891_v58 }
 0xad3   : > { %v2921_v3 = vpack.c.bf16 %v2083_v9, %v2077_v15 }
 0xad5   : > { %v1852_v4 = vpop.f32.mrb[46].mxu1  ;;  %v2087_v5 = vpop.f32.mrb[46].mxu0  ;;  %2922 = vmatprep.subr.bf16.mxu0 %v2921_v3 }
 0xad6   : > { %v2895_v8 = vpack.c.bf16 %v1852_v4, %v1846_v62  ;;  %v1854_v10 = vpop.f32.mrb[47].mxu1  ;;  %v2089_v7 = vpop.f32.mrb[47].mxu0  ;;  %2924 = vmatpush1.bf16.msra.mxu0 %v2923_v18 }
 0xad7   : > { %v2893_v6 = vpack.c.bf16 %v1854_v10, %v1848_v1 }
 0xad9   : > { %v1858_v11 = vpop.f32.mrb[48].mxu1  ;;  %v2093_v12 = vpop.f32.mrb[48].mxu0  ;;  %2894 = vmatprep.subr.bf16.mxu1 %v2893_v6 }
 0xada   : > { %v2927_v13 = vpack.c.bf16 %v2093_v12, %v2087_v5  ;;  %v1860_v17 = vpop.f32.mrb[49].mxu1  ;;  %v2095_v19 = vpop.f32.mrb[49].mxu0  ;;  %2896 = vmatpush1.bf16.msra.mxu1 %v2895_v8 }
 0xadb   : > { %v2925_v20 = vpack.c.bf16 %v2095_v19, %v2089_v7  ;;  %v1671_v8 = vpop.xlane.xlu0 %1670 }
 0xadc   : > { %3036 = vrsqrt.f32 %v1671_v8 }
 0xadd   : > { %v1864_v21 = vpop.f32.mrb[50].mxu1  ;;  %v2099_v22 = vpop.f32.mrb[50].mxu0  ;;  %2926 = vmatprep.subr.bf16.mxu0 %v2925_v20 }
 0xade   : > { %v2899_v23 = vpack.c.bf16 %v1864_v21, %v1858_v11  ;;  %v1866_v24 = vpop.f32.mrb[51].mxu1  ;;  %v2101_v49 = vpop.f32.mrb[51].mxu0  ;;  %2928 = vmatpush1.bf16.msra.mxu0 %v2927_v13 }
 0xadf   : > { %v2897_v25 = vpack.c.bf16 %v1866_v24, %v1860_v17  ;;  %v1673_v17 = vpop.xlane.xlu1 %1672 }
 0xae0   : > { %3038 = vrsqrt.f32 %v1673_v17 }
 0xae1   : > { %v1870_v26 = vpop.f32.mrb[52].mxu1  ;;  %v2105_v27 = vpop.f32.mrb[52].mxu0  ;;  %2898 = vmatprep.subr.bf16.mxu1 %v2897_v25 }
 0xae2   : > { %v2931_v28 = vpack.c.bf16 %v2105_v27, %v2099_v22  ;;  %v1872_v38 = vpop.f32.mrb[53].mxu1  ;;  %v2107_v29 = vpop.f32.mrb[53].mxu0  ;;  %2900 = vmatpush1.bf16.msra.mxu1 %v2899_v23 }
 0xae3   : > { %v2929_v30 = vpack.c.bf16 %v2107_v29, %v2101_v49 }
 0xae5   : > { %v1876_v32 = vpop.f32.mrb[54].mxu1  ;;  %v2111_v33 = vpop.f32.mrb[54].mxu0  ;;  %2930 = vmatprep.subr.bf16.mxu0 %v2929_v30 }
 0xae6   : > { %v2903_v35 = vpack.c.bf16 %v1876_v32, %v1870_v26  ;;  %v1878_v36 = vpop.f32.mrb[55].mxu1  ;;  %v2113_v37 = vpop.f32.mrb[55].mxu0  ;;  %2932 = vmatpush1.bf16.msra.mxu0 %v2931_v28 }
 0xae7   : > { %v2901_v39 = vpack.c.bf16 %v1878_v36, %v1872_v38  ;;  %v3037_v30 = vpop.eup %3036 }
 0xae8   : > { %v1676_v36 = vmul.f32 %v3037_v30, %v3495_v16 }
 0xae9   : > { %v1882_v40 = vpop.f32.mrb[56].mxu1  ;;  %v2117_v43 = vpop.f32.mrb[56].mxu0  ;;  %2902 = vmatprep.subr.bf16.mxu1 %v2901_v39 }
 0xaea   : > { %v2935_v44 = vpack.c.bf16 %v2117_v43, %v2111_v33  ;;  %v1884_v46 = vpop.f32.mrb[57].mxu1  ;;  %v2119_v47 = vpop.f32.mrb[57].mxu0  ;;  %2904 = vmatpush1.bf16.msra.mxu1 %v2903_v35  ;;  %v2312_v43 = vmul.f32 8.0, %v3486_v0 }
 0xaeb   : > { %v2933_v48 = vpack.c.bf16 %v2119_v47, %v2113_v37  ;;  %v3039_v39 = vpop.eup %3038 }
 0xaed   : > { %v1888_v50 = vpop.f32.mrb[58].mxu1  ;;  %v2123_v51 = vpop.f32.mrb[58].mxu0  ;;  %2934 = vmatprep.subr.bf16.mxu0 %v2933_v48 }
 0xaee   : > { %v2907_v31 = vpack.c.bf16 %v1888_v50, %v1882_v40  ;;  %v1890_v2 = vpop.f32.mrb[59].mxu1  ;;  %v2125_v41 = vpop.f32.mrb[59].mxu0  ;;  %2936 = vmatpush1.bf16.msra.mxu0 %v2935_v44  ;;  %v1677_v40 = vmul.f32 %v3039_v39, %v3492_v14  ;;  %v2313_v50 = vmul.f32 8.0, %v3483_v61 }
 0xaef   : > { %v2905_v52 = vpack.c.bf16 %v1890_v2, %v1884_v46 }
 0xaf1   : > { %v1894_v53 = vpop.f32.mrb[60].mxu1  ;;  %v2129_v55 = vpop.f32.mrb[60].mxu0  ;;  %2906 = vmatprep.subr.bf16.mxu1 %v2905_v52 }
 0xaf2   : > { %v2939_v56 = vpack.c.bf16 %v2129_v55, %v2123_v51  ;;  %v1896_v45 = vpop.f32.mrb[61].mxu1  ;;  %v2131_v57 = vpop.f32.mrb[61].mxu0  ;;  %2908 = vmatpush1.bf16.msra.mxu1 %v2907_v31 }
 0xaf3   : > { %v2937_v58 = vpack.c.bf16 %v2131_v57, %v2125_v41 }
 0xaf5   : > { %v1900_v59 = vpop.f32.mrb[62].mxu1  ;;  %v2135_v15 = vpop.f32.mrb[62].mxu0  ;;  %2938 = vmatprep.subr.bf16.mxu0 %v2937_v58 }
 0xaf6   : > { %v2911_v60 = vpack.c.bf16 %v1900_v59, %v1894_v53  ;;  %v1902_v62 = vpop.f32.mrb[63].mxu1  ;;  %v2137_v63 = vpop.f32.mrb[63].mxu0  ;;  %2940 = vmatpush1.bf16.msra.mxu0 %v2939_v56 }
 0xaf7   : > { %v2909_v18 = vpack.c.bf16 %v1902_v62, %v1896_v45 }
 0xaf9   : > { %v1906_v1 = vpop.f32.mrb[64].mxu1  ;;  %v2141_v9 = vpop.f32.mrb[64].mxu0  ;;  %2910 = vmatprep.subr.bf16.mxu1 %v2909_v18 }
 0xafa   : > { %v2943_v3 = vpack.c.bf16 %v2141_v9, %v2135_v15  ;;  %v1908_v4 = vpop.f32.mrb[65].mxu1  ;;  %v2143_v5 = vpop.f32.mrb[65].mxu0  ;;  %2912 = vmatpush1.bf16.msra.mxu1 %v2911_v60 }
 0xafb   : > { %v2941_v10 = vpack.c.bf16 %v2143_v5, %v2137_v63 }
 0xafd   : > { %v1912_v7 = vpop.f32.mrb[66].mxu1  ;;  %v2147_v6 = vpop.f32.mrb[66].mxu0  ;;  %2942 = vmatprep.subr.bf16.mxu0 %v2941_v10 }
 0xafe   : > { %v2915_v11 = vpack.c.bf16 %v1912_v7, %v1906_v1  ;;  %v1914_v12 = vpop.f32.mrb[67].mxu1  ;;  %v2149_v13 = vpop.f32.mrb[67].mxu0  ;;  %2944 = vmatpush1.bf16.msra.mxu0 %v2943_v3 }
 0xaff   : > { %v2913_v19 = vpack.c.bf16 %v1914_v12, %v1908_v4 }
 0xb01   : > { %v1918_v20 = vpop.f32.mrb[68].mxu1  ;;  %v2153_v21 = vpop.f32.mrb[68].mxu0  ;;  %2914 = vmatprep.subr.bf16.mxu1 %v2913_v19 }
 0xb02   : > { %v2947_v22 = vpack.c.bf16 %v2153_v21, %v2147_v6  ;;  %v1920_v23 = vpop.f32.mrb[69].mxu1  ;;  %v2155_v24 = vpop.f32.mrb[69].mxu0  ;;  %2916 = vmatpush1.bf16.msra.mxu1 %v2915_v11  ;;  %v2575_v6 = vld [vmem:[%s3636_s7 + $0x1] ss:$0 sm:$0xff] }
 0xb03   : > { %v2945_v49 = vpack.c.bf16 %v2155_v24, %v2149_v13 }
 0xb05   : > { %v1924_v25 = vpop.f32.mrb[70].mxu1  ;;  %v2159_v26 = vpop.f32.mrb[70].mxu0  ;;  %2946 = vmatprep.subr.bf16.mxu0 %v2945_v49 }
 0xb06   : > { %v2919_v27 = vpack.c.bf16 %v1924_v25, %v1918_v20  ;;  %v1926_v28 = vpop.f32.mrb[71].mxu1  ;;  %v2161_v38 = vpop.f32.mrb[71].mxu0  ;;  %2948 = vmatpush1.bf16.msra.mxu0 %v2947_v22 }
 0xb07   : > { %v2917_v29 = vpack.c.bf16 %v1926_v28, %v1920_v23 }
 0xb09   : > { %v2165_v32 = vpop.f32.mrb[72].mxu0  ;;  %2918 = vmatprep.subr.bf16.mxu1 %v2917_v29 }
 0xb0a   : > { %v2951_v33 = vpack.c.bf16 %v2165_v32, %v2159_v26  ;;  %v2167_v35 = vpop.f32.mrb[73].mxu0  ;;  %2920 = vmatpush1.bf16.msra.mxu1 %v2919_v27 }
 0xb0b   : > { %v2949_v37 = vpack.c.bf16 %v2167_v35, %v2161_v38 }
 0xb0d   : > { %2235 = vmatmul.mubr.f32.vlgmr.msra.gmra.mrb[72].mxu1 %v1676_v36  ;;  %2950 = vmatprep.subr.bf16.mxu0 %v2949_v37 }
 0xb0e   : > { %2952 = vmatpush1.bf16.msra.mxu0 %v2951_v33 }
 0xb11   : > { %2306 = vmatmul.mubr.f32.vlgmr.msra.gmra.mrb[74].mxu0 %v1677_v40 }
 0xbe0   : > { %v2236_v44 = vpop.f32.mrb[72].mxu1 }
 0xbe1   : > { %v2314_v46 = vadd.f32 %v2312_v43, %v2236_v44  ;;  %v2238_v47 = vpop.f32.mrb[73].mxu1 }
 0xbe2   : > { %v2316_v48 = vadd.f32 8.0, %v2238_v47 }
 0xbe4   : > { %3040 = vrcp.f32 %v2316_v48  ;;  %v2307_v51 = vpop.f32.mrb[74].mxu0 }
 0xbe5   : > { %v2315_v31 = vadd.f32 %v2313_v50, %v2307_v51  ;;  %v2309_v16 = vpop.f32.mrb[75].mxu0 }
 0xbe6   : > { %v2317_v2 = vadd.f32 8.0, %v2309_v16 }
 0xbe8   : > { %3042 = vrcp.f32 %v2317_v2 }
 0xbee   : > { %v3041_v41 = vpop.eup %3040 }
 0xbef   : > { %2322 = vperm.xlu0 %3010, %v3041_v41  }
 0xbf2   : > { %v3043_v52 = vpop.eup %3042 }
 0xbf3   : > { %2327 = vperm.xlu1 %3011, %v3043_v52  }
 0xc6e   : > { %v2323_v14 = vpop.permute.xlu0 %2322 }
 0xc6f   : > { %v2330_v53 = vmul.f32 %v2323_v14, %v2314_v46 }
 0xc71   : > { %v2332_v0 = vadd.f32 %v2330_v53, %v3470_v54 }
 0xc72   : > { %v2328_v55 = vpop.permute.xlu1 %2327 }
 0xc73   : > { %v2331_v56 = vmul.f32 %v2328_v55, %v2315_v31  ;;  %v2334_v45 = vmul.f32 0.5, %v2332_v0 }
 0xc75   : > { %2340 = vadd.xlane.f32.xlu0 %v2334_v45  ;;  %v2333_v61 = vadd.f32 %v2331_v56, %v3475_v42 }
 0xc77   : > { %v2335_v57 = vmul.f32 0.5, %v2333_v61 }
 0xc79   : > { %2342 = vadd.xlane.f32.xlu1 %v2335_v57 }
 0xd02   : > { %v2341_v58 = vpop.xlane.xlu0 %2340 }
 0xd03   : > { %v2344_v59 = vmul.f32 0.03125, %v2341_v58 }
 0xd05   : > { %v2346_v15 = vsub.f32 %v2334_v45, %v2344_v59 }
 0xd06   : > { %v2343_v60 = vpop.xlane.xlu1 %2342 }
 0xd07   : > { %v2345_v62 = vmul.f32 0.03125, %v2343_v60  ;;  %v2348_v63 = vmul.f32 %v3308_v34, %v2346_v15 }
 0xd09   : > { %v2347_v18 = vsub.f32 %v2335_v57, %v2345_v62  ;;  %v2350_v1 = vmul.f32 %v2348_v63, %v2348_v63 }
 0xd0b   : > { %2352 = vadd.xlane.f32.xlu0 %v2350_v1  ;;  %v2349_v54 = vmul.f32 %v3308_v34, %v2347_v18  ;;  %v2576_v34 = vld [vmem:[%s3637_s8 + $0x1] ss:$0 sm:$0xff] }
 0xd0d   : > { %v2351_v9 = vmul.f32 %v2349_v54, %v2349_v54 }
 0xd0f   : > { %2354 = vadd.xlane.f32.xlu0 %v2351_v9 }
 0xd98   : > { %v2353_v3 = vpop.xlane.xlu0 %2352 }
 0xd99   : > { %v2356_v4 = vmul.f32 0.03125, %v2353_v3 }
 0xd9b   : > { %v2358_v42 = vadd.f32 1e-05, %v2356_v4 }
 0xd9c   : > { %v2355_v5 = vpop.xlane.xlu0 %2354 }
 0xd9d   : > { %3044 = vrsqrt.f32 %v2358_v42  ;;  %v2357_v8 = vmul.f32 0.03125, %v2355_v5 }
 0xd9f   : > { %v2359_v10 = vadd.f32 1e-05, %v2357_v8 }
 0xda1   : > { %3046 = vrsqrt.f32 %v2359_v10 }
 0xda7   : > { %v3045_v7 = vpop.eup %3044 }
 0xda8   : > { %v2362_v11 = vmul.f32 %v3045_v7, %v2348_v63 }
 0xdaa   : > { %v2370_v12 = vmul.f32 %v2575_v6, %v2362_v11 }
 0xdab   : > { %v3047_v13 = vpop.eup %3046 }
 0xdac   : > { %v2378_v17 = vadd.f32 %v2576_v34, %v2370_v12  ;;  %v2363_v19 = vmul.f32 %v3047_v13, %v2349_v54 }
 0xdae   : > { %v2380_v20 = vmax.f32 %v2378_v17, 0.0  ;;  %v2371_v21 = vmul.f32 %v2575_v6, %v2363_v19 }
 0xdb0   : > { %v2379_v22 = vadd.f32 %v2576_v34, %v2371_v21  ;;  %2383 = vst.msk [vmem:[%s357_s14] sm:$0xff] %vm2382_vm11, %v2380_v20 }
 0xdb2   : > { %v2381_v23 = vmax.f32 %v2379_v22, 0.0 }
 0xdb4   : > { %2384 = vst.msk [vmem:[%s357_s14 + $0x8] sm:$0xff] %vm2382_vm11, %v2381_v23 }
 0xdb5   : > { %3089 = shalt.err (!%p3086_p7)
}
 0xdb6   : > { %s3090_s26 = scalar_lea.hbm %s3584_s17, 256  ;;  %s3094_s14 = scalar_lea.hbm %s3638_s9, 512 }
 0xdb7   : > { %p3091_p8 = scmp.ne.s32.totalorder %s3584_s17, %s3090_s26  ;;  %p3095_p1 = scmp.lt.u32.totalorder %s3584_s17, %s3638_s9 }
 0xdb8   : > { %p3096_p0 = scmp.lt.u32.totalorder %s3094_s14, %s3090_s26  ;;  %p3098_p6 = scmp.lt.u32.totalorder %s3090_s26, %s3584_s17 }
 0xdb9   : > { %p3092_p11 = pnand %p3091_p8, %p3649_p9 }
 0xdba   : > { %p3097_p5 = por %p3096_p0, %p3095_p1 }
 0xdbb   : > { %p3093_p13 = pneg %p3092_p11 }
 0xdbc   : > { %p3099_p10 = por %p3098_p6, %p3097_p5 }
 0xdbe   : > { %p3100_p12 = pnand %p3099_p10, %p3093_p13 }
 0xdc0   : > { %3103 = shalt.err (!%p3100_p12)
}
 0xdc1   : > { %s3151_s25 = smov 128   ;;  %s3152_s13 = smov 8  }
 0xdc2   : > { %2957 = dma.vmem_to_hbm [thread:$0]  (%p3649_p9), %s3586_s27, 256, %s3584_s17, %s3588_s22, %s3151_s25, %s3151_s25, %s3152_s13  }
 0xdc3 PF: > { %p2969_p2 = scmp.ge.s32.totalorder %s3142_s12, 2  ;;  %s2414_s28 = sand.u32 1, %s3130_s30  }
 0xdc4   : > { %p3650_p3 = scmp.ne.s32.totalorder %s3643_s20, 0  ;;  %s2415_s23 = scalar_lea.sflag [#allocation4], %s2414_s28 }
 0xdc6   : > { %p2964_p4 = pnand %p2969_p2, %p3650_p3 }
 0xdc8   : > { %3125 = dma.done.wait (!%p2964_p4), %s2415_s23, 256  }
 0xdc9   : > { %3127 = vsyncadd (!%p2964_p4), %s2415_s23, 4294967040  ;;  %p20_p7 = scmp.ge.s32.totalorder %s3228_s15, 4   ;;  %s3651_s30 = smov %s3134_s10 }
 0xdca   : > { %s3652_s10 = smov %s3138_s11  ;;  %s3653_s11 = smov %s3239_s18 }
 0xdcb   : > { %s3654_s12 = smov %s3228_s15  ;;  %22 = sbr.rel (!%p20_p7) target bundleno = 4 (0x4), region = 102 }
 0xdd2   :  { %2420 = vsyncpa [#allocation3], 1 }
 0xdd3   :  { %2422 = vsyncpa [#allocation3 + $0x1], 1 }
 0xdd4   :  { %2423 = vsyncpa [#allocation4], 1 }
 0xdd5   :  { %2425 = vsyncpa [#allocation4 + $0x1], 1 }

</bundles_post_ra>
